<compile_context>
chip_gen: v7x
topology: tpu7x:2x2x1
jax: 0.10.0
libtpu: 0.0.40
codegen_flags: <defaults>
</compile_context>

<pallas_src>
import functools
import math

import jax
import jax.numpy as jnp
from jax import lax
from jax.experimental import pallas as pl
from jax.experimental.pallas import tpu as pltpu


# ----------------------------------------------------------------------------
# Fused Pallas kernel: one grid step == one block of Bb batch elements
# ----------------------------------------------------------------------------

def _fused_layer_kernel(x_ref, kv_ref, kpb_ref, amb_ref,
                        wq_ref, bq_ref, wk_ref, bk_ref, wv_ref, bv_ref,
                        wo_ref, bo_ref, lnw_ref, lnb_ref,
                        w1_ref, b1_ref, w2_ref, b2_ref,
                        o_ref, attn_sc,
                        *, num_heads, head_dim, bb, seq, tk, embed_dim):
    E = embed_dim
    x2d = x_ref[...]                                   # (bb*seq, E) f32 residual
    xb = x2d.astype(jnp.bfloat16)
    kvb = kv_ref[...].astype(jnp.bfloat16)             # (bb*tk, E)

    # ---- projections: bf16 MXU inputs, f32 accumulation ---------------------
    # (q-scaling is already folded into wq/bq at init)
    q2d = jnp.dot(xb, wq_ref[...], preferred_element_type=jnp.float32) + bq_ref[...]
    k2d = jnp.dot(kvb, wk_ref[...], preferred_element_type=jnp.float32) + bk_ref[...]
    v2d = jnp.dot(kvb, wv_ref[...], preferred_element_type=jnp.float32) + bv_ref[...]

    # reshape while still f32 (sublane-tile aligned: seq/tk multiples of 8),
    # then cast to bf16 for the attention matmuls.
    q = q2d.reshape(bb, seq, E).astype(jnp.bfloat16)
    k = k2d.reshape(bb, tk, E).astype(jnp.bfloat16)
    v = v2d.reshape(bb, tk, E).astype(jnp.bfloat16)

    # ---- additive bias: per-batch key padding + grid-invariant attn mask ----
    # kpb_ref: (bb, 1, tk) f32 (-1e30 where padded), amb_ref: (seq, tk) f32
    bias = kpb_ref[...] + amb_ref[...][None, :, :]     # (bb, seq, tk)

    # ---- multi-head attention: batched-over-Bb dot_generals per head --------
    # Each head's output is written straight into the VMEM scratch slice
    # (no concatenate, no per-head K transpose).
    for h in range(num_heads):
        lo = h * head_dim
        hi = lo + head_dim
        qh = q[:, :, lo:hi]                            # (bb, seq, Dh)
        kh = k[:, :, lo:hi]                            # (bb, tk, Dh)
        vh = v[:, :, lo:hi]                            # (bb, tk, Dh)
        s = jnp.einsum('bqd,bkd->bqk', qh, kh,
                       preferred_element_type=jnp.float32)       # (bb, seq, tk)
        s = s + bias
        m = jnp.max(s, axis=-1, keepdims=True)
        p = jnp.exp(s - m)
        denom = jnp.sum(p, axis=-1, keepdims=True)
        oh = jnp.einsum('bqk,bkd->bqd', p.astype(jnp.bfloat16), vh,
                        preferred_element_type=jnp.float32)      # (bb, seq, Dh)
        attn_sc[:, :, lo:hi] = oh * pl.reciprocal(denom, approx=True)

    # ---- output projection ---------------------------------------------------
    attn = attn_sc[...].reshape(bb * seq, E).astype(jnp.bfloat16)
    attn = jnp.dot(attn, wo_ref[...], preferred_element_type=jnp.float32) + bo_ref[...]

    # ---- Norm_Layer: residual + LN + FFN + residual + LN (same LN params) ----
    lnw = lnw_ref[...]
    lnb = lnb_ref[...]

    def layer_norm(val):
        mu = jnp.mean(val, axis=-1, keepdims=True)
        var = jnp.mean(jnp.square(val - mu), axis=-1, keepdims=True)
        return (val - mu) * lax.rsqrt(var + 1e-5) * lnw + lnb

    y = layer_norm(attn + x2d)                         # dropout is identity (eval)
    h1 = jnp.maximum(
        jnp.dot(y.astype(jnp.bfloat16), w1_ref[...],
                preferred_element_type=jnp.float32) + b1_ref[...], 0.0)
    h2 = (jnp.dot(h1.astype(jnp.bfloat16), w2_ref[...],
                  preferred_element_type=jnp.float32) + b2_ref[...])
    # TODO(synk): with E < 128 (demo shape) this store is not lane-dense; for
    # production pick E as a multiple of 128 (or pack rows) for unmasked vst.
    o_ref[...] = layer_norm(y + h2).astype(o_ref.dtype)


def fused_encoder_layer(x2d, kv2d, kp_bias, am_bias, params, num_heads,
                        *, batch, seq, tk, batch_block):
    """x2d: (B*S, E) f32, kv2d: (B*Tk, E) f32, kp_bias: (B,1,Tk) f32,
    am_bias: (S,Tk) f32.  Returns (B*S, E) f32."""
    E = x2d.shape[-1]
    F = params["w1"].shape[1]
    bb = batch_block
    assert batch % bb == 0, "batch_block must divide batch"
    head_dim = E // num_heads

    kern = functools.partial(_fused_layer_kernel, num_heads=num_heads,
                             head_dim=head_dim, bb=bb, seq=seq, tk=tk,
                             embed_dim=E)
    c2 = lambda i: (0, 0)
    # TODO(synk): at production E/F on v7x (64 MiB VMEM) the constant weight
    # blocks should be single-buffered (pipeline_mode=pl.Buffered(1)) and/or the
    # FFN split over an extra 'arbitrary' grid axis.
    in_specs = [
        pl.BlockSpec((bb * seq, E), lambda i: (i, 0)),   # x (batch-blocked)
        pl.BlockSpec((bb * tk, E), lambda i: (i, 0)),    # text-region feats
        pl.BlockSpec((bb, 1, tk), lambda i: (i, 0, 0)),  # key-padding bias (f32)
        pl.BlockSpec((seq, tk), c2),                     # attn_mask bias (f32)
        pl.BlockSpec((E, E), c2), pl.BlockSpec((1, E), c2),   # wq (pre-scaled), bq
        pl.BlockSpec((E, E), c2), pl.BlockSpec((1, E), c2),   # wk, bk
        pl.BlockSpec((E, E), c2), pl.BlockSpec((1, E), c2),   # wv, bv
        pl.BlockSpec((E, E), c2), pl.BlockSpec((1, E), c2),   # wo, bo
        pl.BlockSpec((1, E), c2), pl.BlockSpec((1, E), c2),   # ln_w, ln_b
        pl.BlockSpec((E, F), c2), pl.BlockSpec((1, F), c2),   # w1, b1
        pl.BlockSpec((F, E), c2), pl.BlockSpec((1, E), c2),   # w2, b2
    ]
    return pl.pallas_call(
        kern,
        out_shape=jax.ShapeDtypeStruct((batch * seq, E), x2d.dtype),
        grid=(batch // bb,),
        in_specs=in_specs,
        out_specs=pl.BlockSpec((bb * seq, E), lambda i: (i, 0)),
        scratch_shapes=[pltpu.VMEM((bb, seq, E), jnp.float32)],
        compiler_params=pltpu.CompilerParams(
            dimension_semantics=("parallel",),
            vmem_limit_bytes=48 * 1024 * 1024),
    )(x2d, kv2d, kp_bias, am_bias,
      params["wq"], params["bq"], params["wk"], params["bk"],
      params["wv"], params["bv"], params["wo"], params["bo"],
      params["ln_w"], params["ln_b"],
      params["w1"], params["b1"], params["w2"], params["b2"])


# ----------------------------------------------------------------------------
# Module wrapper (parameters + tiny layout glue outside the kernel)
# ----------------------------------------------------------------------------

def _xavier_uniform(key, shape):
    fan_in, fan_out = shape
    a = math.sqrt(6.0 / (fan_in + fan_out))
    return jax.random.uniform(key, shape, jnp.float32, minval=-a, maxval=a)


class TransformerEncoderLayerTextRegion:
    def __init__(self, key, embed_dim=32, num_heads=4, ffn_dim=64,
                 max_batch_block=8):
        assert embed_dim % num_heads == 0
        self.embed_dim = embed_dim
        self.num_heads = num_heads
        self.head_dim = embed_dim // num_heads
        self.max_batch_block = max_batch_block
        scaling = self.head_dim ** -0.5

        keys = jax.random.split(key, 6)
        E, Fd = embed_dim, ffn_dim
        bf = jnp.bfloat16
        wq = _xavier_uniform(keys[0], (E, E)) * scaling   # fold q-scaling into wq
        wk = _xavier_uniform(keys[1], (E, E))
        wv = _xavier_uniform(keys[2], (E, E))
        wo = _xavier_uniform(keys[3], (E, E))
        w1 = _xavier_uniform(keys[4], (E, Fd))
        w2 = _xavier_uniform(keys[5], (Fd, E))
        self.params = dict(
            wq=wq.astype(bf), bq=jnp.zeros((1, E), jnp.float32),  # (0 * scale == 0)
            wk=wk.astype(bf), bk=jnp.zeros((1, E), jnp.float32),
            wv=wv.astype(bf), bv=jnp.zeros((1, E), jnp.float32),
            wo=wo.astype(bf), bo=jnp.zeros((1, E), jnp.float32),
            ln_w=jnp.ones((1, E), jnp.float32),
            ln_b=jnp.zeros((1, E), jnp.float32),
            w1=w1.astype(bf), b1=jnp.zeros((1, Fd), jnp.float32),
            w2=w2.astype(bf), b2=jnp.zeros((1, E), jnp.float32),
        )
        # TODO(synk): dropout / attention_dropout / activation_dropout are
        # training-time only (identity in eval mode) and are omitted.

    def _pick_batch_block(self, B):
        if B <= self.max_batch_block:
            return B
        for d in range(self.max_batch_block, 0, -1):
            if B % d == 0:
                return d
        return 1

    def __call__(self, x, text_region_img_features, text_region_img_mask,
                 attn_mask=None):
        S, B, E = x.shape
        Tk = text_region_img_features.shape[0]
        assert S % 8 == 0 and Tk % 8 == 0, "seq / n_regions must be multiples of 8"
        # one cheap layout transpose per input (batch-major, flattened rows)
        x2d = jnp.transpose(x, (1, 0, 2)).reshape(B * S, E)
        kv2d = jnp.transpose(text_region_img_features, (1, 0, 2)).reshape(B * Tk, E)
        # precompute the additive biases outside the kernel:
        #   key-padding -> large finite negative (fully-masked row degrades to a
        #   uniform distribution instead of NaN); attn_mask -> -1e8 (as in torch).
        kp_bias = jnp.where(text_region_img_mask.astype(bool), -1e30, 0.0
                            ).astype(jnp.float32).reshape(B, 1, Tk)
        if attn_mask is None:
            am_bias = jnp.zeros((S, Tk), jnp.float32)
        else:
            am_bias = jnp.where(attn_mask.astype(bool), -1e8, 0.0
                                ).astype(jnp.float32)
        bb = self._pick_batch_block(B)
        out2d = fused_encoder_layer(x2d, kv2d, kp_bias, am_bias, self.params,
                                    self.num_heads, batch=B, seq=S, tk=Tk,
                                    batch_block=bb)                  # (B*S, E)
        return out2d.reshape(B, S, E).transpose(1, 0, 2)             # (S, B, E)


# ----------------------------------------------------------------------------
# Pure-JAX reference (f32 math on the same bf16-rounded weights)
# ----------------------------------------------------------------------------

def reference_forward(layer, x, feats, mask, attn_mask):
    p = {k: v.astype(jnp.float32) for k, v in layer.params.items()}
    S, B, E = x.shape
    Tk = feats.shape[0]
    H = layer.num_heads
    Dh = E // H
    q = x @ p["wq"] + p["bq"][0]                 # scaling already folded into wq
    k = feats @ p["wk"] + p["bk"][0]
    v = feats @ p["wv"] + p["bv"][0]
    q = q.reshape(S, B, H, Dh).transpose(1, 2, 0, 3)
    k = k.reshape(Tk, B, H, Dh).transpose(1, 2, 0, 3)
    v = v.reshape(Tk, B, H, Dh).transpose(1, 2, 0, 3)
    s = jnp.einsum('bhqd,bhkd->bhqk', q, k)
    bias = jnp.where(mask.astype(bool), -1e30, 0.0)[:, None, None, :]
    if attn_mask is not None:
        bias = bias + jnp.where(attn_mask.astype(bool), -1e8, 0.0)[None, None, :, :]
    prob = jax.nn.softmax(s + bias, axis=-1)
    o = jnp.einsum('bhqk,bhkd->bhqd', prob, v)
    o = o.transpose(2, 0, 1, 3).reshape(S, B, E)
    attn = o @ p["wo"] + p["bo"][0]

    def ln(val):
        mu = val.mean(-1, keepdims=True)
        var = ((val - mu) ** 2).mean(-1, keepdims=True)
        return (val - mu) / jnp.sqrt(var + 1e-5) * p["ln_w"][0] + p["ln_b"][0]

    y = ln(attn + x)
    h = jax.nn.relu(y @ p["w1"] + p["b1"][0])
    return ln(y + (h @ p["w2"] + p["b2"][0]))


# ----------------------------------------------------------------------------
# Example
# ----------------------------------------------------------------------------

if __name__ == "__main__":
    key = jax.random.PRNGKey(0)
    k_params, k_x, k_kv = jax.random.split(key, 3)

    S, B, E = 8, 2, 32          # seq_len, batch, embed_dim
    Tk = 16                     # number of text-region image features
    layer = TransformerEncoderLayerTextRegion(k_params, embed_dim=E,
                                              num_heads=4, ffn_dim=64)

    x = jax.random.normal(k_x, (S, B, E), jnp.float32)
    text_region_img_features = jax.random.normal(k_kv, (Tk, B, E), jnp.float32)
    # padding mask: 1 == masked; batch 0 has 12 valid regions, batch 1 has 10
    lens = jnp.array([12, 10])
    text_region_img_mask = (jnp.arange(Tk)[None, :] >= lens[:, None])
    # attn_mask (T_tgt, T_src): mask out the first two regions for every query
    attn_mask = jnp.broadcast_to(jnp.arange(Tk) < 2, (S, Tk))

    out = layer(x, text_region_img_features, text_region_img_mask, attn_mask)
    out = jax.block_until_ready(out)
    assert out.shape == (S, B, E)
    assert bool(jnp.all(jnp.isfinite(out)))

    ref = reference_forward(layer, x, text_region_img_features,
                            text_region_img_mask, attn_mask)
    # bf16 matmuls (+approx reciprocal) vs. an f32 reference -> modest tolerance
    err = float(jnp.max(jnp.abs(out - ref)))
    assert bool(jnp.allclose(out, ref, atol=5e-2, rtol=5e-2)), err
    print("KERNEL_OK")
</pallas_src>

<mosaic_0001>
module attributes {stable_mosaic.version = 11 : i64} {
  func.func @_fused_layer_kernel(%arg0: i32, %arg1: memref<16x32xf32, #tpu.memory_space<vmem>>, %arg2: memref<32x32xf32, #tpu.memory_space<vmem>>, %arg3: memref<2x1x16xf32, #tpu.memory_space<vmem>>, %arg4: memref<8x16xf32, #tpu.memory_space<vmem>>, %arg5: memref<32x32xbf16, #tpu.memory_space<vmem>>, %arg6: memref<1x32xf32, #tpu.memory_space<vmem>>, %arg7: memref<32x32xbf16, #tpu.memory_space<vmem>>, %arg8: memref<1x32xf32, #tpu.memory_space<vmem>>, %arg9: memref<32x32xbf16, #tpu.memory_space<vmem>>, %arg10: memref<1x32xf32, #tpu.memory_space<vmem>>, %arg11: memref<32x32xbf16, #tpu.memory_space<vmem>>, %arg12: memref<1x32xf32, #tpu.memory_space<vmem>>, %arg13: memref<1x32xf32, #tpu.memory_space<vmem>>, %arg14: memref<1x32xf32, #tpu.memory_space<vmem>>, %arg15: memref<32x64xbf16, #tpu.memory_space<vmem>>, %arg16: memref<1x64xf32, #tpu.memory_space<vmem>>, %arg17: memref<64x32xbf16, #tpu.memory_space<vmem>>, %arg18: memref<1x32xf32, #tpu.memory_space<vmem>>, %arg19: memref<16x32xf32, #tpu.memory_space<vmem>>, %arg20: memref<2x8x32xf32, #tpu.memory_space<vmem>>) attributes {dimension_semantics = [#tpu.dimension_semantics<parallel>], iteration_bounds = array<i64: 1>, scalar_prefetch = 0 : i64, scratch_operands = 1 : i64, tpu.core_type = #tpu.core_type<tc>, window_params = [{transform_indices = @transform_0, window_bounds = array<i64: 16, 32>}, {transform_indices = @transform_1, window_bounds = array<i64: 32, 32>}, {transform_indices = @transform_2, window_bounds = array<i64: 2, 1, 16>}, {pipeline_mode = #tpu.pipeline_mode<synchronous>, transform_indices = @transform_3, window_bounds = array<i64: 8, 16>}, {pipeline_mode = #tpu.pipeline_mode<synchronous>, transform_indices = @transform_4, window_bounds = array<i64: 32, 32>}, {pipeline_mode = #tpu.pipeline_mode<synchronous>, transform_indices = @transform_5, window_bounds = array<i64: 1, 32>}, {pipeline_mode = #tpu.pipeline_mode<synchronous>, transform_indices = @transform_6, window_bounds = array<i64: 32, 32>}, {pipeline_mode = #tpu.pipeline_mode<synchronous>, transform_indices = @transform_7, window_bounds = array<i64: 1, 32>}, {pipeline_mode = #tpu.pipeline_mode<synchronous>, transform_indices = @transform_8, window_bounds = array<i64: 32, 32>}, {pipeline_mode = #tpu.pipeline_mode<synchronous>, transform_indices = @transform_9, window_bounds = array<i64: 1, 32>}, {pipeline_mode = #tpu.pipeline_mode<synchronous>, transform_indices = @transform_10, window_bounds = array<i64: 32, 32>}, {pipeline_mode = #tpu.pipeline_mode<synchronous>, transform_indices = @transform_11, window_bounds = array<i64: 1, 32>}, {pipeline_mode = #tpu.pipeline_mode<synchronous>, transform_indices = @transform_12, window_bounds = array<i64: 1, 32>}, {pipeline_mode = #tpu.pipeline_mode<synchronous>, transform_indices = @transform_13, window_bounds = array<i64: 1, 32>}, {pipeline_mode = #tpu.pipeline_mode<synchronous>, transform_indices = @transform_14, window_bounds = array<i64: 32, 64>}, {pipeline_mode = #tpu.pipeline_mode<synchronous>, transform_indices = @transform_15, window_bounds = array<i64: 1, 64>}, {pipeline_mode = #tpu.pipeline_mode<synchronous>, transform_indices = @transform_16, window_bounds = array<i64: 64, 32>}, {pipeline_mode = #tpu.pipeline_mode<synchronous>, transform_indices = @transform_17, window_bounds = array<i64: 1, 32>}, {transform_indices = @transform_18, window_bounds = array<i64: 16, 32>}]} {
    %c0 = arith.constant 0 : index
    %c0_0 = arith.constant 0 : index
    %0 = vector.load %arg1[%c0, %c0_0] : memref<16x32xf32, #tpu.memory_space<vmem>>, vector<16x32xf32>
    %1 = arith.truncf %0 : vector<16x32xf32> to vector<16x32xbf16>
    %c0_1 = arith.constant 0 : index
    %c0_2 = arith.constant 0 : index
    %2 = vector.load %arg2[%c0_1, %c0_2] : memref<32x32xf32, #tpu.memory_space<vmem>>, vector<32x32xf32>
    %3 = arith.truncf %2 : vector<32x32xf32> to vector<32x32xbf16>
    %c0_3 = arith.constant 0 : index
    %c0_4 = arith.constant 0 : index
    %4 = vector.load %arg5[%c0_3, %c0_4] : memref<32x32xbf16, #tpu.memory_space<vmem>>, vector<32x32xbf16>
    %cst = arith.constant dense<0.000000e+00> : vector<16x32xf32>
    %5 = tpu.matmul %1, %4, %cst {dimension_numbers = #tpu.dot_dimension_numbers<[1], [0], [0], [1], [0, 0, 1, 1], [], []>} : vector<16x32xbf16>, vector<32x32xbf16>, vector<16x32xf32> -> vector<16x32xf32>
    %c0_5 = arith.constant 0 : index
    %c0_6 = arith.constant 0 : index
    %6 = vector.load %arg6[%c0_5, %c0_6] : memref<1x32xf32, #tpu.memory_space<vmem>>, vector<1x32xf32>
    %7 = vector.broadcast %6 : vector<1x32xf32> to vector<16x32xf32>
    %8 = arith.addf %5, %7 : vector<16x32xf32>
    %c0_7 = arith.constant 0 : index
    %c0_8 = arith.constant 0 : index
    %9 = vector.load %arg7[%c0_7, %c0_8] : memref<32x32xbf16, #tpu.memory_space<vmem>>, vector<32x32xbf16>
    %cst_9 = arith.constant dense<0.000000e+00> : vector<32x32xf32>
    %10 = tpu.matmul %3, %9, %cst_9 {dimension_numbers = #tpu.dot_dimension_numbers<[1], [0], [0], [1], [0, 0, 1, 1], [], []>} : vector<32x32xbf16>, vector<32x32xbf16>, vector<32x32xf32> -> vector<32x32xf32>
    %c0_10 = arith.constant 0 : index
    %c0_11 = arith.constant 0 : index
    %11 = vector.load %arg8[%c0_10, %c0_11] : memref<1x32xf32, #tpu.memory_space<vmem>>, vector<1x32xf32>
    %12 = vector.broadcast %11 : vector<1x32xf32> to vector<32x32xf32>
    %13 = arith.addf %10, %12 : vector<32x32xf32>
    %c0_12 = arith.constant 0 : index
    %c0_13 = arith.constant 0 : index
    %14 = vector.load %arg9[%c0_12, %c0_13] : memref<32x32xbf16, #tpu.memory_space<vmem>>, vector<32x32xbf16>
    %cst_14 = arith.constant dense<0.000000e+00> : vector<32x32xf32>
    %15 = tpu.matmul %3, %14, %cst_14 {dimension_numbers = #tpu.dot_dimension_numbers<[1], [0], [0], [1], [0, 0, 1, 1], [], []>} : vector<32x32xbf16>, vector<32x32xbf16>, vector<32x32xf32> -> vector<32x32xf32>
    %c0_15 = arith.constant 0 : index
    %c0_16 = arith.constant 0 : index
    %16 = vector.load %arg10[%c0_15, %c0_16] : memref<1x32xf32, #tpu.memory_space<vmem>>, vector<1x32xf32>
    %17 = vector.broadcast %16 : vector<1x32xf32> to vector<32x32xf32>
    %18 = arith.addf %15, %17 : vector<32x32xf32>
    %19 = vector.shape_cast %8 : vector<16x32xf32> to vector<2x8x32xf32>
    %20 = arith.truncf %19 : vector<2x8x32xf32> to vector<2x8x32xbf16>
    %21 = vector.shape_cast %13 : vector<32x32xf32> to vector<2x16x32xf32>
    %22 = arith.truncf %21 : vector<2x16x32xf32> to vector<2x16x32xbf16>
    %23 = vector.shape_cast %18 : vector<32x32xf32> to vector<2x16x32xf32>
    %24 = arith.truncf %23 : vector<2x16x32xf32> to vector<2x16x32xbf16>
    %c0_17 = arith.constant 0 : index
    %c0_18 = arith.constant 0 : index
    %c0_19 = arith.constant 0 : index
    %25 = vector.load %arg3[%c0_17, %c0_18, %c0_19] : memref<2x1x16xf32, #tpu.memory_space<vmem>>, vector<2x1x16xf32>
    %c0_20 = arith.constant 0 : index
    %c0_21 = arith.constant 0 : index
    %26 = vector.load %arg4[%c0_20, %c0_21] : memref<8x16xf32, #tpu.memory_space<vmem>>, vector<8x16xf32>
    %27 = vector.shape_cast %26 : vector<8x16xf32> to vector<1x8x16xf32>
    %28 = vector.broadcast %25 : vector<2x1x16xf32> to vector<2x8x16xf32>
    %29 = vector.broadcast %27 : vector<1x8x16xf32> to vector<2x8x16xf32>
    %30 = arith.addf %28, %29 : vector<2x8x16xf32>
    %31 = vector.extract_strided_slice %20 {offsets = [0, 0, 0], sizes = [2, 8, 8], strides = [1, 1, 1]} : vector<2x8x32xbf16> to vector<2x8x8xbf16>
    %32 = vector.extract_strided_slice %22 {offsets = [0, 0, 0], sizes = [2, 16, 8], strides = [1, 1, 1]} : vector<2x16x32xbf16> to vector<2x16x8xbf16>
    %33 = vector.extract_strided_slice %24 {offsets = [0, 0, 0], sizes = [2, 16, 8], strides = [1, 1, 1]} : vector<2x16x32xbf16> to vector<2x16x8xbf16>
    "tpu.trace_start"() <{level = 10 : i32, message = "bqd,bkd->bqk"}> : () -> ()
    %cst_22 = arith.constant dense<0.000000e+00> : vector<2x8x16xf32>
    %34 = tpu.matmul %31, %32, %cst_22 {dimension_numbers = #tpu.dot_dimension_numbers<[2], [2], [1], [1], [0, 0, 0, 1, 1, 1], [0], [0]>} : vector<2x8x8xbf16>, vector<2x16x8xbf16>, vector<2x8x16xf32> -> vector<2x8x16xf32>
    "tpu.trace_stop"() : () -> ()
    %35 = arith.addf %34, %30 : vector<2x8x16xf32>
    %cst_23 = arith.constant dense<0xFF800000> : vector<2x8xf32>
    %36 = vector.multi_reduction <maximumf>, %35, %cst_23 [2] : vector<2x8x16xf32> to vector<2x8xf32>
    %37 = vector.shape_cast %36 : vector<2x8xf32> to vector<2x8x1xf32>
    %38 = vector.broadcast %37 : vector<2x8x1xf32> to vector<2x8x16xf32>
    %39 = arith.subf %35, %38 : vector<2x8x16xf32>
    %40 = math.exp %39 : vector<2x8x16xf32>
    %cst_24 = arith.constant dense<0.000000e+00> : vector<2x8xf32>
    %41 = vector.multi_reduction <add>, %40, %cst_24 [2] : vector<2x8x16xf32> to vector<2x8xf32>
    %42 = vector.shape_cast %41 : vector<2x8xf32> to vector<2x8x1xf32>
    %43 = arith.truncf %40 : vector<2x8x16xf32> to vector<2x8x16xbf16>
    "tpu.trace_start"() <{level = 10 : i32, message = "bqk,bkd->bqd"}> : () -> ()
    %cst_25 = arith.constant dense<0.000000e+00> : vector<2x8x8xf32>
    %44 = tpu.matmul %43, %33, %cst_25 {dimension_numbers = #tpu.dot_dimension_numbers<[2], [1], [1], [2], [0, 0, 0, 1, 1, 2], [0], [0]>} : vector<2x8x16xbf16>, vector<2x16x8xbf16>, vector<2x8x8xf32> -> vector<2x8x8xf32>
    "tpu.trace_stop"() : () -> ()
    %45 = tpu.reciprocal %42 {approx = true} : vector<2x8x1xf32> -> vector<2x8x1xf32>
    %46 = vector.broadcast %45 : vector<2x8x1xf32> to vector<2x8x8xf32>
    %47 = arith.mulf %44, %46 : vector<2x8x8xf32>
    %c0_26 = arith.constant 0 : index
    %c0_27 = arith.constant 0 : index
    %c0_28 = arith.constant 0 : index
    %48 = vector.load %arg20[%c0_26, %c0_27, %c0_28] : memref<2x8x32xf32, #tpu.memory_space<vmem>>, vector<2x8x8xf32>
    tpu.vector_store %arg20[%c0_26, %c0_27, %c0_28], %47 {strides = array<i32>} : memref<2x8x32xf32, #tpu.memory_space<vmem>>, vector<2x8x8xf32>,
    %49 = vector.extract_strided_slice %20 {offsets = [0, 0, 8], sizes = [2, 8, 8], strides = [1, 1, 1]} : vector<2x8x32xbf16> to vector<2x8x8xbf16>
    %50 = vector.extract_strided_slice %22 {offsets = [0, 0, 8], sizes = [2, 16, 8], strides = [1, 1, 1]} : vector<2x16x32xbf16> to vector<2x16x8xbf16>
    %51 = vector.extract_strided_slice %24 {offsets = [0, 0, 8], sizes = [2, 16, 8], strides = [1, 1, 1]} : vector<2x16x32xbf16> to vector<2x16x8xbf16>
    "tpu.trace_start"() <{level = 10 : i32, message = "bqd,bkd->bqk"}> : () -> ()
    %cst_29 = arith.constant dense<0.000000e+00> : vector<2x8x16xf32>
    %52 = tpu.matmul %49, %50, %cst_29 {dimension_numbers = #tpu.dot_dimension_numbers<[2], [2], [1], [1], [0, 0, 0, 1, 1, 1], [0], [0]>} : vector<2x8x8xbf16>, vector<2x16x8xbf16>, vector<2x8x16xf32> -> vector<2x8x16xf32>
    "tpu.trace_stop"() : () -> ()
    %53 = arith.addf %52, %30 : vector<2x8x16xf32>
    %cst_30 = arith.constant dense<0xFF800000> : vector<2x8xf32>
    %54 = vector.multi_reduction <maximumf>, %53, %cst_30 [2] : vector<2x8x16xf32> to vector<2x8xf32>
    %55 = vector.shape_cast %54 : vector<2x8xf32> to vector<2x8x1xf32>
    %56 = vector.broadcast %55 : vector<2x8x1xf32> to vector<2x8x16xf32>
    %57 = arith.subf %53, %56 : vector<2x8x16xf32>
    %58 = math.exp %57 : vector<2x8x16xf32>
    %cst_31 = arith.constant dense<0.000000e+00> : vector<2x8xf32>
    %59 = vector.multi_reduction <add>, %58, %cst_31 [2] : vector<2x8x16xf32> to vector<2x8xf32>
    %60 = vector.shape_cast %59 : vector<2x8xf32> to vector<2x8x1xf32>
    %61 = arith.truncf %58 : vector<2x8x16xf32> to vector<2x8x16xbf16>
    "tpu.trace_start"() <{level = 10 : i32, message = "bqk,bkd->bqd"}> : () -> ()
    %cst_32 = arith.constant dense<0.000000e+00> : vector<2x8x8xf32>
    %62 = tpu.matmul %61, %51, %cst_32 {dimension_numbers = #tpu.dot_dimension_numbers<[2], [1], [1], [2], [0, 0, 0, 1, 1, 2], [0], [0]>} : vector<2x8x16xbf16>, vector<2x16x8xbf16>, vector<2x8x8xf32> -> vector<2x8x8xf32>
    "tpu.trace_stop"() : () -> ()
    %63 = tpu.reciprocal %60 {approx = true} : vector<2x8x1xf32> -> vector<2x8x1xf32>
    %64 = vector.broadcast %63 : vector<2x8x1xf32> to vector<2x8x8xf32>
    %65 = arith.mulf %62, %64 : vector<2x8x8xf32>
    %c0_33 = arith.constant 0 : index
    %c0_34 = arith.constant 0 : index
    %c8 = arith.constant 8 : index
    %66 = vector.load %arg20[%c0_33, %c0_34, %c8] : memref<2x8x32xf32, #tpu.memory_space<vmem>>, vector<2x8x8xf32>
    tpu.vector_store %arg20[%c0_33, %c0_34, %c8], %65 {strides = array<i32>} : memref<2x8x32xf32, #tpu.memory_space<vmem>>, vector<2x8x8xf32>,
    %67 = vector.extract_strided_slice %20 {offsets = [0, 0, 16], sizes = [2, 8, 8], strides = [1, 1, 1]} : vector<2x8x32xbf16> to vector<2x8x8xbf16>
    %68 = vector.extract_strided_slice %22 {offsets = [0, 0, 16], sizes = [2, 16, 8], strides = [1, 1, 1]} : vector<2x16x32xbf16> to vector<2x16x8xbf16>
    %69 = vector.extract_strided_slice %24 {offsets = [0, 0, 16], sizes = [2, 16, 8], strides = [1, 1, 1]} : vector<2x16x32xbf16> to vector<2x16x8xbf16>
    "tpu.trace_start"() <{level = 10 : i32, message = "bqd,bkd->bqk"}> : () -> ()
    %cst_35 = arith.constant dense<0.000000e+00> : vector<2x8x16xf32>
    %70 = tpu.matmul %67, %68, %cst_35 {dimension_numbers = #tpu.dot_dimension_numbers<[2], [2], [1], [1], [0, 0, 0, 1, 1, 1], [0], [0]>} : vector<2x8x8xbf16>, vector<2x16x8xbf16>, vector<2x8x16xf32> -> vector<2x8x16xf32>
    "tpu.trace_stop"() : () -> ()
    %71 = arith.addf %70, %30 : vector<2x8x16xf32>
    %cst_36 = arith.constant dense<0xFF800000> : vector<2x8xf32>
    %72 = vector.multi_reduction <maximumf>, %71, %cst_36 [2] : vector<2x8x16xf32> to vector<2x8xf32>
    %73 = vector.shape_cast %72 : vector<2x8xf32> to vector<2x8x1xf32>
    %74 = vector.broadcast %73 : vector<2x8x1xf32> to vector<2x8x16xf32>
    %75 = arith.subf %71, %74 : vector<2x8x16xf32>
    %76 = math.exp %75 : vector<2x8x16xf32>
    %cst_37 = arith.constant dense<0.000000e+00> : vector<2x8xf32>
    %77 = vector.multi_reduction <add>, %76, %cst_37 [2] : vector<2x8x16xf32> to vector<2x8xf32>
    %78 = vector.shape_cast %77 : vector<2x8xf32> to vector<2x8x1xf32>
    %79 = arith.truncf %76 : vector<2x8x16xf32> to vector<2x8x16xbf16>
    "tpu.trace_start"() <{level = 10 : i32, message = "bqk,bkd->bqd"}> : () -> ()
    %cst_38 = arith.constant dense<0.000000e+00> : vector<2x8x8xf32>
    %80 = tpu.matmul %79, %69, %cst_38 {dimension_numbers = #tpu.dot_dimension_numbers<[2], [1], [1], [2], [0, 0, 0, 1, 1, 2], [0], [0]>} : vector<2x8x16xbf16>, vector<2x16x8xbf16>, vector<2x8x8xf32> -> vector<2x8x8xf32>
    "tpu.trace_stop"() : () -> ()
    %81 = tpu.reciprocal %78 {approx = true} : vector<2x8x1xf32> -> vector<2x8x1xf32>
    %82 = vector.broadcast %81 : vector<2x8x1xf32> to vector<2x8x8xf32>
    %83 = arith.mulf %80, %82 : vector<2x8x8xf32>
    %c0_39 = arith.constant 0 : index
    %c0_40 = arith.constant 0 : index
    %c16 = arith.constant 16 : index
    %84 = vector.load %arg20[%c0_39, %c0_40, %c16] : memref<2x8x32xf32, #tpu.memory_space<vmem>>, vector<2x8x8xf32>
    tpu.vector_store %arg20[%c0_39, %c0_40, %c16], %83 {strides = array<i32>} : memref<2x8x32xf32, #tpu.memory_space<vmem>>, vector<2x8x8xf32>,
    %85 = vector.extract_strided_slice %20 {offsets = [0, 0, 24], sizes = [2, 8, 8], strides = [1, 1, 1]} : vector<2x8x32xbf16> to vector<2x8x8xbf16>
    %86 = vector.extract_strided_slice %22 {offsets = [0, 0, 24], sizes = [2, 16, 8], strides = [1, 1, 1]} : vector<2x16x32xbf16> to vector<2x16x8xbf16>
    %87 = vector.extract_strided_slice %24 {offsets = [0, 0, 24], sizes = [2, 16, 8], strides = [1, 1, 1]} : vector<2x16x32xbf16> to vector<2x16x8xbf16>
    "tpu.trace_start"() <{level = 10 : i32, message = "bqd,bkd->bqk"}> : () -> ()
    %cst_41 = arith.constant dense<0.000000e+00> : vector<2x8x16xf32>
    %88 = tpu.matmul %85, %86, %cst_41 {dimension_numbers = #tpu.dot_dimension_numbers<[2], [2], [1], [1], [0, 0, 0, 1, 1, 1], [0], [0]>} : vector<2x8x8xbf16>, vector<2x16x8xbf16>, vector<2x8x16xf32> -> vector<2x8x16xf32>
    "tpu.trace_stop"() : () -> ()
    %89 = arith.addf %88, %30 : vector<2x8x16xf32>
    %cst_42 = arith.constant dense<0xFF800000> : vector<2x8xf32>
    %90 = vector.multi_reduction <maximumf>, %89, %cst_42 [2] : vector<2x8x16xf32> to vector<2x8xf32>
    %91 = vector.shape_cast %90 : vector<2x8xf32> to vector<2x8x1xf32>
    %92 = vector.broadcast %91 : vector<2x8x1xf32> to vector<2x8x16xf32>
    %93 = arith.subf %89, %92 : vector<2x8x16xf32>
    %94 = math.exp %93 : vector<2x8x16xf32>
    %cst_43 = arith.constant dense<0.000000e+00> : vector<2x8xf32>
    %95 = vector.multi_reduction <add>, %94, %cst_43 [2] : vector<2x8x16xf32> to vector<2x8xf32>
    %96 = vector.shape_cast %95 : vector<2x8xf32> to vector<2x8x1xf32>
    %97 = arith.truncf %94 : vector<2x8x16xf32> to vector<2x8x16xbf16>
    "tpu.trace_start"() <{level = 10 : i32, message = "bqk,bkd->bqd"}> : () -> ()
    %cst_44 = arith.constant dense<0.000000e+00> : vector<2x8x8xf32>
    %98 = tpu.matmul %97, %87, %cst_44 {dimension_numbers = #tpu.dot_dimension_numbers<[2], [1], [1], [2], [0, 0, 0, 1, 1, 2], [0], [0]>} : vector<2x8x16xbf16>, vector<2x16x8xbf16>, vector<2x8x8xf32> -> vector<2x8x8xf32>
    "tpu.trace_stop"() : () -> ()
    %99 = tpu.reciprocal %96 {approx = true} : vector<2x8x1xf32> -> vector<2x8x1xf32>
    %100 = vector.broadcast %99 : vector<2x8x1xf32> to vector<2x8x8xf32>
    %101 = arith.mulf %98, %100 : vector<2x8x8xf32>
    %c0_45 = arith.constant 0 : index
    %c0_46 = arith.constant 0 : index
    %c24 = arith.constant 24 : index
    %102 = vector.load %arg20[%c0_45, %c0_46, %c24] : memref<2x8x32xf32, #tpu.memory_space<vmem>>, vector<2x8x8xf32>
    tpu.vector_store %arg20[%c0_45, %c0_46, %c24], %101 {strides = array<i32>} : memref<2x8x32xf32, #tpu.memory_space<vmem>>, vector<2x8x8xf32>,
    %c0_47 = arith.constant 0 : index
    %c0_48 = arith.constant 0 : index
    %c0_49 = arith.constant 0 : index
    %103 = vector.load %arg20[%c0_47, %c0_48, %c0_49] : memref<2x8x32xf32, #tpu.memory_space<vmem>>, vector<2x8x32xf32>
    %104 = vector.shape_cast %103 : vector<2x8x32xf32> to vector<16x32xf32>
    %105 = arith.truncf %104 : vector<16x32xf32> to vector<16x32xbf16>
    %c0_50 = arith.constant 0 : index
    %c0_51 = arith.constant 0 : index
    %106 = vector.load %arg11[%c0_50, %c0_51] : memref<32x32xbf16, #tpu.memory_space<vmem>>, vector<32x32xbf16>
    %cst_52 = arith.constant dense<0.000000e+00> : vector<16x32xf32>
    %107 = tpu.matmul %105, %106, %cst_52 {dimension_numbers = #tpu.dot_dimension_numbers<[1], [0], [0], [1], [0, 0, 1, 1], [], []>} : vector<16x32xbf16>, vector<32x32xbf16>, vector<16x32xf32> -> vector<16x32xf32>
    %c0_53 = arith.constant 0 : index
    %c0_54 = arith.constant 0 : index
    %108 = vector.load %arg12[%c0_53, %c0_54] : memref<1x32xf32, #tpu.memory_space<vmem>>, vector<1x32xf32>
    %109 = vector.broadcast %108 : vector<1x32xf32> to vector<16x32xf32>
    %110 = arith.addf %107, %109 : vector<16x32xf32>
    %c0_55 = arith.constant 0 : index
    %c0_56 = arith.constant 0 : index
    %111 = vector.load %arg13[%c0_55, %c0_56] : memref<1x32xf32, #tpu.memory_space<vmem>>, vector<1x32xf32>
    %c0_57 = arith.constant 0 : index
    %c0_58 = arith.constant 0 : index
    %112 = vector.load %arg14[%c0_57, %c0_58] : memref<1x32xf32, #tpu.memory_space<vmem>>, vector<1x32xf32>
    %113 = arith.addf %110, %0 : vector<16x32xf32>
    %cst_59 = arith.constant dense<0.000000e+00> : vector<16xf32>
    %114 = vector.multi_reduction <add>, %113, %cst_59 [1] : vector<16x32xf32> to vector<16xf32>
    %115 = vector.shape_cast %114 : vector<16xf32> to vector<16x1xf32>
    %cst_60 = arith.constant 3.200000e+01 : f32
    %116 = vector.broadcast %cst_60 : f32 to vector<16x1xf32>
    %117 = arith.divf %115, %116 : vector<16x1xf32>
    %118 = vector.broadcast %117 : vector<16x1xf32> to vector<16x32xf32>
    %119 = arith.subf %113, %118 : vector<16x32xf32>
    %120 = arith.mulf %119, %119 : vector<16x32xf32>
    %cst_61 = arith.constant dense<0.000000e+00> : vector<16xf32>
    %121 = vector.multi_reduction <add>, %120, %cst_61 [1] : vector<16x32xf32> to vector<16xf32>
    %122 = vector.shape_cast %121 : vector<16xf32> to vector<16x1xf32>
    %cst_62 = arith.constant 3.200000e+01 : f32
    %123 = vector.broadcast %cst_62 : f32 to vector<16x1xf32>
    %124 = arith.divf %122, %123 : vector<16x1xf32>
    %125 = vector.broadcast %117 : vector<16x1xf32> to vector<16x32xf32>
    %126 = arith.subf %113, %125 : vector<16x32xf32>
    %cst_63 = arith.constant 9.99999974E-6 : f32
    %127 = vector.broadcast %cst_63 : f32 to vector<16x1xf32>
    %128 = arith.addf %124, %127 : vector<16x1xf32>
    %129 = math.rsqrt %128 : vector<16x1xf32>
    %130 = vector.broadcast %129 : vector<16x1xf32> to vector<16x32xf32>
    %131 = arith.mulf %126, %130 : vector<16x32xf32>
    %132 = vector.broadcast %111 : vector<1x32xf32> to vector<16x32xf32>
    %133 = arith.mulf %131, %132 : vector<16x32xf32>
    %134 = vector.broadcast %112 : vector<1x32xf32> to vector<16x32xf32>
    %135 = arith.addf %133, %134 : vector<16x32xf32>
    %136 = arith.truncf %135 : vector<16x32xf32> to vector<16x32xbf16>
    %c0_64 = arith.constant 0 : index
    %c0_65 = arith.constant 0 : index
    %137 = vector.load %arg15[%c0_64, %c0_65] : memref<32x64xbf16, #tpu.memory_space<vmem>>, vector<32x64xbf16>
    %cst_66 = arith.constant dense<0.000000e+00> : vector<16x64xf32>
    %138 = tpu.matmul %136, %137, %cst_66 {dimension_numbers = #tpu.dot_dimension_numbers<[1], [0], [0], [1], [0, 0, 1, 1], [], []>} : vector<16x32xbf16>, vector<32x64xbf16>, vector<16x64xf32> -> vector<16x64xf32>
    %c0_67 = arith.constant 0 : index
    %c0_68 = arith.constant 0 : index
    %139 = vector.load %arg16[%c0_67, %c0_68] : memref<1x64xf32, #tpu.memory_space<vmem>>, vector<1x64xf32>
    %140 = vector.broadcast %139 : vector<1x64xf32> to vector<16x64xf32>
    %141 = arith.addf %138, %140 : vector<16x64xf32>
    %cst_69 = arith.constant 0.000000e+00 : f32
    %142 = vector.broadcast %cst_69 : f32 to vector<16x64xf32>
    %143 = arith.maximumf %141, %142 : vector<16x64xf32>
    %144 = arith.truncf %143 : vector<16x64xf32> to vector<16x64xbf16>
    %c0_70 = arith.constant 0 : index
    %c0_71 = arith.constant 0 : index
    %145 = vector.load %arg17[%c0_70, %c0_71] : memref<64x32xbf16, #tpu.memory_space<vmem>>, vector<64x32xbf16>
    %cst_72 = arith.constant dense<0.000000e+00> : vector<16x32xf32>
    %146 = tpu.matmul %144, %145, %cst_72 {dimension_numbers = #tpu.dot_dimension_numbers<[1], [0], [0], [1], [0, 0, 1, 1], [], []>} : vector<16x64xbf16>, vector<64x32xbf16>, vector<16x32xf32> -> vector<16x32xf32>
    %c0_73 = arith.constant 0 : index
    %c0_74 = arith.constant 0 : index
    %147 = vector.load %arg18[%c0_73, %c0_74] : memref<1x32xf32, #tpu.memory_space<vmem>>, vector<1x32xf32>
    %148 = vector.broadcast %147 : vector<1x32xf32> to vector<16x32xf32>
    %149 = arith.addf %146, %148 : vector<16x32xf32>
    %150 = arith.addf %135, %149 : vector<16x32xf32>
    %cst_75 = arith.constant dense<0.000000e+00> : vector<16xf32>
    %151 = vector.multi_reduction <add>, %150, %cst_75 [1] : vector<16x32xf32> to vector<16xf32>
    %152 = vector.shape_cast %151 : vector<16xf32> to vector<16x1xf32>
    %cst_76 = arith.constant 3.200000e+01 : f32
    %153 = vector.broadcast %cst_76 : f32 to vector<16x1xf32>
    %154 = arith.divf %152, %153 : vector<16x1xf32>
    %155 = vector.broadcast %154 : vector<16x1xf32> to vector<16x32xf32>
    %156 = arith.subf %150, %155 : vector<16x32xf32>
    %157 = arith.mulf %156, %156 : vector<16x32xf32>
    %cst_77 = arith.constant dense<0.000000e+00> : vector<16xf32>
    %158 = vector.multi_reduction <add>, %157, %cst_77 [1] : vector<16x32xf32> to vector<16xf32>
    %159 = vector.shape_cast %158 : vector<16xf32> to vector<16x1xf32>
    %cst_78 = arith.constant 3.200000e+01 : f32
    %160 = vector.broadcast %cst_78 : f32 to vector<16x1xf32>
    %161 = arith.divf %159, %160 : vector<16x1xf32>
    %162 = vector.broadcast %154 : vector<16x1xf32> to vector<16x32xf32>
    %163 = arith.subf %150, %162 : vector<16x32xf32>
    %cst_79 = arith.constant 9.99999974E-6 : f32
    %164 = vector.broadcast %cst_79 : f32 to vector<16x1xf32>
    %165 = arith.addf %161, %164 : vector<16x1xf32>
    %166 = math.rsqrt %165 : vector<16x1xf32>
    %167 = vector.broadcast %166 : vector<16x1xf32> to vector<16x32xf32>
    %168 = arith.mulf %163, %167 : vector<16x32xf32>
    %169 = vector.broadcast %111 : vector<1x32xf32> to vector<16x32xf32>
    %170 = arith.mulf %168, %169 : vector<16x32xf32>
    %171 = vector.broadcast %112 : vector<1x32xf32> to vector<16x32xf32>
    %172 = arith.addf %170, %171 : vector<16x32xf32>
    %c0_80 = arith.constant 0 : index
    %c0_81 = arith.constant 0 : index
    %173 = vector.load %arg19[%c0_80, %c0_81] : memref<16x32xf32, #tpu.memory_space<vmem>>, vector<16x32xf32>
    tpu.vector_store %arg19[%c0_80, %c0_81], %172 {strides = array<i32>} : memref<16x32xf32, #tpu.memory_space<vmem>>, vector<16x32xf32>,
    return
  }
  func.func @transform_0(%arg0: i32) -> (i32, i32) {
    %c0_i32 = arith.constant 0 : i32
    %c0_i32_0 = arith.constant 0 : i32
    return %arg0, %c0_i32 : i32, i32
  }
  func.func @transform_1(%arg0: i32) -> (i32, i32) {
    %c0_i32 = arith.constant 0 : i32
    %c0_i32_0 = arith.constant 0 : i32
    return %arg0, %c0_i32 : i32, i32
  }
  func.func @transform_2(%arg0: i32) -> (i32, i32, i32) {
    %c0_i32 = arith.constant 0 : i32
    %c0_i32_0 = arith.constant 0 : i32
    %c0_i32_1 = arith.constant 0 : i32
    return %arg0, %c0_i32, %c0_i32_0 : i32, i32, i32
  }
  func.func @transform_3(%arg0: i32) -> (i32, i32) {
    %c0_i32 = arith.constant 0 : i32
    %c0_i32_0 = arith.constant 0 : i32
    %c0_i32_1 = arith.constant 0 : i32
    return %c0_i32, %c0_i32_0 : i32, i32
  }
  func.func @transform_4(%arg0: i32) -> (i32, i32) {
    %c0_i32 = arith.constant 0 : i32
    %c0_i32_0 = arith.constant 0 : i32
    %c0_i32_1 = arith.constant 0 : i32
    return %c0_i32, %c0_i32_0 : i32, i32
  }
  func.func @transform_5(%arg0: i32) -> (i32, i32) {
    %c0_i32 = arith.constant 0 : i32
    %c0_i32_0 = arith.constant 0 : i32
    %c0_i32_1 = arith.constant 0 : i32
    return %c0_i32, %c0_i32_0 : i32, i32
  }
  func.func @transform_6(%arg0: i32) -> (i32, i32) {
    %c0_i32 = arith.constant 0 : i32
    %c0_i32_0 = arith.constant 0 : i32
    %c0_i32_1 = arith.constant 0 : i32
    return %c0_i32, %c0_i32_0 : i32, i32
  }
  func.func @transform_7(%arg0: i32) -> (i32, i32) {
    %c0_i32 = arith.constant 0 : i32
    %c0_i32_0 = arith.constant 0 : i32
    %c0_i32_1 = arith.constant 0 : i32
    return %c0_i32, %c0_i32_0 : i32, i32
  }
  func.func @transform_8(%arg0: i32) -> (i32, i32) {
    %c0_i32 = arith.constant 0 : i32
    %c0_i32_0 = arith.constant 0 : i32
    %c0_i32_1 = arith.constant 0 : i32
    return %c0_i32, %c0_i32_0 : i32, i32
  }
  func.func @transform_9(%arg0: i32) -> (i32, i32) {
    %c0_i32 = arith.constant 0 : i32
    %c0_i32_0 = arith.constant 0 : i32
    %c0_i32_1 = arith.constant 0 : i32
    return %c0_i32, %c0_i32_0 : i32, i32
  }
  func.func @transform_10(%arg0: i32) -> (i32, i32) {
    %c0_i32 = arith.constant 0 : i32
    %c0_i32_0 = arith.constant 0 : i32
    %c0_i32_1 = arith.constant 0 : i32
    return %c0_i32, %c0_i32_0 : i32, i32
  }
  func.func @transform_11(%arg0: i32) -> (i32, i32) {
    %c0_i32 = arith.constant 0 : i32
    %c0_i32_0 = arith.constant 0 : i32
    %c0_i32_1 = arith.constant 0 : i32
    return %c0_i32, %c0_i32_0 : i32, i32
  }
  func.func @transform_12(%arg0: i32) -> (i32, i32) {
    %c0_i32 = arith.constant 0 : i32
    %c0_i32_0 = arith.constant 0 : i32
    %c0_i32_1 = arith.constant 0 : i32
    return %c0_i32, %c0_i32_0 : i32, i32
  }
  func.func @transform_13(%arg0: i32) -> (i32, i32) {
    %c0_i32 = arith.constant 0 : i32
    %c0_i32_0 = arith.constant 0 : i32
    %c0_i32_1 = arith.constant 0 : i32
    return %c0_i32, %c0_i32_0 : i32, i32
  }
  func.func @transform_14(%arg0: i32) -> (i32, i32) {
    %c0_i32 = arith.constant 0 : i32
    %c0_i32_0 = arith.constant 0 : i32
    %c0_i32_1 = arith.constant 0 : i32
    return %c0_i32, %c0_i32_0 : i32, i32
  }
  func.func @transform_15(%arg0: i32) -> (i32, i32) {
    %c0_i32 = arith.constant 0 : i32
    %c0_i32_0 = arith.constant 0 : i32
    %c0_i32_1 = arith.constant 0 : i32
    return %c0_i32, %c0_i32_0 : i32, i32
  }
  func.func @transform_16(%arg0: i32) -> (i32, i32) {
    %c0_i32 = arith.constant 0 : i32
    %c0_i32_0 = arith.constant 0 : i32
    %c0_i32_1 = arith.constant 0 : i32
    return %c0_i32, %c0_i32_0 : i32, i32
  }
  func.func @transform_17(%arg0: i32) -> (i32, i32) {
    %c0_i32 = arith.constant 0 : i32
    %c0_i32_0 = arith.constant 0 : i32
    %c0_i32_1 = arith.constant 0 : i32
    return %c0_i32, %c0_i32_0 : i32, i32
  }
  func.func @transform_18(%arg0: i32) -> (i32, i32) {
    %c0_i32 = arith.constant 0 : i32
    %c0_i32_0 = arith.constant 0 : i32
    return %arg0, %c0_i32 : i32, i32
  }
}

</mosaic_0001>

<bundles_post_ra>
// kernel: tpu_custom_call.1
= control target key start
LH: loop header
LB: loop body
LE: loop exit
PB: predicated region body
PF: predicated region fallthrough
CT: control target
= control target key end

     0   :  { %s2805_s0 = inlined_call_operand.vmem [shape: f32[16,32], index: 0, kind: input, shape index: {}]   ;;  %s2806_s1 = inlined_call_operand.vmem [shape: f32[32,32], index: 1, kind: input, shape index: {}]   ;;  %s2807_s2 = inlined_call_operand.hbm [shape: f32[2,1,16], index: 2, kind: input, shape index: {}]   ;;  %s2808_s3 = inlined_call_operand.hbm [shape: f32[8,16], index: 3, kind: input, shape index: {}]   ;;  %s2809_s4 = inlined_call_operand.hbm [shape: bf16[32,32], index: 4, kind: input, shape index: {}]   ;;  %s2810_s5 = inlined_call_operand.vmem [shape: f32[1,32], index: 5, kind: input, shape index: {}]   ;;  %s2811_s6 = inlined_call_operand.hbm [shape: bf16[32,32], index: 6, kind: input, shape index: {}]   ;;  %s2812_s7 = inlined_call_operand.hbm [shape: f32[1,32], index: 7, kind: input, shape index: {}]   ;;  %s2813_s8 = inlined_call_operand.hbm [shape: bf16[32,32], index: 8, kind: input, shape index: {}]   ;;  %s2814_s9 = inlined_call_operand.hbm [shape: f32[1,32], index: 9, kind: input, shape index: {}]   ;;  %s2815_s10 = inlined_call_operand.vmem [shape: bf16[32,32], index: 10, kind: input, shape index: {}]   ;;  %s2816_s11 = inlined_call_operand.hbm [shape: f32[1,32], index: 11, kind: input, shape index: {}]   ;;  %s2817_s12 = inlined_call_operand.hbm [shape: f32[1,32], index: 12, kind: input, shape index: {}]   ;;  %s2818_s13 = inlined_call_operand.hbm [shape: f32[1,32], index: 13, kind: input, shape index: {}]   ;;  %s2819_s14 = inlined_call_operand.vmem [shape: bf16[32,64], index: 14, kind: input, shape index: {}]   ;;  %s2820_s15 = inlined_call_operand.vmem [shape: f32[1,64], index: 15, kind: input, shape index: {}]   ;;  %s2821_s16 = inlined_call_operand.vmem [shape: bf16[64,32], index: 16, kind: input, shape index: {}]   ;;  %s2822_s17 = inlined_call_operand.vmem [shape: f32[1,32], index: 17, kind: input, shape index: {}]   ;;  %s2823_s18 = inlined_call_operand.hbm [shape: f32[16,32], index: 18, kind: output, shape index: {}]  }
   0x1   :  { %2827 = sst [smem:[#allocation28_spill]] %s2805_s0 }
   0x2   :  { %2828 = sst [smem:[#allocation29_spill]] %s2806_s1 }
   0x3   :  { %2829 = sst [smem:[#allocation30_spill]] %s2807_s2 }
   0x4   :  { %23 = vsyncpa [#allocation4], 0 }
   0x5   :  { %24 = vsyncpa [#allocation7], 0 }
   0x6   :  { %25 = vsyncpa [#allocation10], 0 }
   0x7   :  { %26 = vsyncpa [#allocation13], 0 }
   0x8   :  { %27 = vsyncpa [#allocation16], 0 }
   0x9   :  { %28 = vsyncpa [#allocation19], 0 }
   0xa   :  { %29 = vsyncpa [#allocation5], 0  ;;  %s2239_s27 = smov [#allocation6]   ;;  %s1983_s0 = scalar_lea.hbm %s2808_s3, 128 }
   0xb   :  { %s52_s28 = sshll.u32 %s2239_s27, 4  ;;  %p1984_p0 = scmp.ne.s32.totalorder %s2808_s3, %s1983_s0  ;;  %s53_s28 = int_to_ptr.vmem [resolvable:$true] %s52_s28 }
   0xc   :  { %p1987_p1 = scmp.lt.u32.totalorder %s1983_s0, %s2808_s3 }
   0xe   :  { %p1989_p2 = pnand %p1987_p1, %p1984_p0 }
  0x10   :  { %1992 = shalt.err (!%p1989_p2)
}
  0x11   :  { %s1993_s22 = scalar_lea.vmem %s53_s28, 128  ;;  %p1998_p4 = scmp.lt.s32.totalorder %s53_s28, %s53_s28 }
  0x12   :  { %p1994_p3 = scmp.ne.s32.totalorder %s53_s28, %s1993_s22  ;;  %p1999_p5 = scmp.lt.s32.totalorder %s1993_s22, %s1993_s22 }
  0x14   :  { %p2000_p6 = por %p1999_p5, %p1998_p4 }
  0x16   :  { %p2001_p7 = pnand %p2000_p6, %p1994_p3 }
  0x18   :  { %2004 = shalt.err (!%p2001_p7)
}
  0x19   :  { %55 = dma.hbm_to_vmem [thread:$0]  %s2808_s3, 128, %s53_s28, [#allocation7]  }
  0x1a   :  { %s2240_s24 = smov [#allocation9]   ;;  %s2241_s26 = smov [#allocation12]  }
  0x1b   :  { %s75_s25 = sshll.u32 %s2240_s24, 4  ;;  %s97_s27 = sshll.u32 %s2241_s26, 4  ;;  %s76_s25 = int_to_ptr.vmem [resolvable:$true] %s75_s25  ;;  %s98_s27 = int_to_ptr.vmem [resolvable:$true] %s97_s27 }
  0x1c   :  { %s2005_s0 = scalar_lea.hbm %s2811_s6, 256 }
  0x1d   :  { %p2006_p8 = scmp.ne.s32.totalorder %s2811_s6, %s2005_s0  ;;  %p2009_p9 = scmp.lt.u32.totalorder %s2005_s0, %s2811_s6 }
  0x1f   :  { %p2011_p10 = pnand %p2009_p9, %p2006_p8 }
  0x21   :  { %2014 = shalt.err (!%p2011_p10)
}
  0x22   :  { %s2015_s3 = scalar_lea.vmem %s76_s25, 256  ;;  %p2020_p12 = scmp.lt.s32.totalorder %s76_s25, %s76_s25 }
  0x23   :  { %p2016_p11 = scmp.ne.s32.totalorder %s76_s25, %s2015_s3  ;;  %p2021_p13 = scmp.lt.s32.totalorder %s2015_s3, %s2015_s3 }
  0x25   :  { %p2022_p0 = por %p2021_p13, %p2020_p12 }
  0x27   :  { %p2023_p1 = pnand %p2022_p0, %p2016_p11 }
  0x29   :  { %2026 = shalt.err (!%p2023_p1)
}
  0x2a   :  { %s2242_s28 = smov 64   ;;  %s2243_s22 = smov 4  }
  0x2b   :  { %81 = dma.hbm_to_vmem [thread:$0]  %s2811_s6, 256, %s76_s25, [#allocation10], %s2242_s28, %s2242_s28, %s2243_s22  }
  0x2c   :  { %s2027_s29 = scalar_lea.hbm %s2813_s8, 256 }
  0x2d   :  { %p2028_p2 = scmp.ne.s32.totalorder %s2813_s8, %s2027_s29  ;;  %p2031_p3 = scmp.lt.u32.totalorder %s2027_s29, %s2813_s8 }
  0x2f   :  { %p2033_p4 = pnand %p2031_p3, %p2028_p2 }
  0x31   :  { %2036 = shalt.err (!%p2033_p4)
}
  0x32   :  { %s2037_s20 = scalar_lea.vmem %s98_s27, 256  ;;  %p2042_p6 = scmp.lt.s32.totalorder %s98_s27, %s98_s27 }
  0x33   :  { %p2038_p5 = scmp.ne.s32.totalorder %s98_s27, %s2037_s20  ;;  %p2043_p7 = scmp.lt.s32.totalorder %s2037_s20, %s2037_s20 }
  0x35   :  { %p2044_p8 = por %p2043_p7, %p2042_p6 }
  0x37   :  { %p2045_p9 = pnand %p2044_p8, %p2038_p5 }
  0x39   :  { %2048 = shalt.err (!%p2045_p9)
}
  0x3a   :  { %103 = dma.hbm_to_vmem [thread:$0]  %s2813_s8, 256, %s98_s27, [#allocation13], %s2242_s28, %s2242_s28, %s2243_s22  }
  0x3b   :  { %s2244_s21 = smov [#allocation15]   ;;  %s2245_s2 = smov [#allocation3]  }
  0x3c   :  { %s122_s3 = sshll.u32 %s2244_s21, 4  ;;  %s39_s23 = sshll.u32 %s2245_s2, 4  ;;  %s123_s3 = int_to_ptr.vmem [resolvable:$true] %s122_s3  ;;  %s40_s23 = int_to_ptr.vmem [resolvable:$true] %s39_s23 }
  0x3d   :  { %s2049_s29 = scalar_lea.hbm %s2816_s11, 16 }
  0x3e   :  { %p2050_p10 = scmp.ne.s32.totalorder %s2816_s11, %s2049_s29  ;;  %p2053_p11 = scmp.lt.u32.totalorder %s2049_s29, %s2816_s11 }
  0x40   :  { %p2055_p12 = pnand %p2053_p11, %p2050_p10 }
  0x42   :  { %2058 = shalt.err (!%p2055_p12)
}
  0x43   :  { %s2059_s8 = scalar_lea.vmem %s123_s3, 16  ;;  %s2063_s27 = scalar_lea.vmem %s123_s3, 32 }
  0x44   :  { %p2060_p13 = scmp.ne.s32.totalorder %s123_s3, %s2059_s8  ;;  %p2064_p0 = scmp.lt.s32.totalorder %s123_s3, %s123_s3 }
  0x45   :  { %p2065_p1 = scmp.lt.s32.totalorder %s2063_s27, %s2059_s8 }
  0x47   :  { %p2066_p2 = por %p2065_p1, %p2064_p0 }
  0x49   :  { %p2067_p3 = pnand %p2066_p2, %p2060_p13 }
  0x4b   :  { %2070 = shalt.err (!%p2067_p3)
}
  0x4c   :  { %125 = dma.hbm_to_vmem [thread:$0]  %s2816_s11, 16, %s123_s3, [#allocation16]  }
  0x4d   :  { %s2830_s2 = sld [smem:[#allocation30_spill]] }
  0x53   :  { %s2071_s24 = scalar_lea.hbm %s2830_s2, 32 }
  0x54   :  { %p2072_p4 = scmp.ne.s32.totalorder %s2830_s2, %s2071_s24  ;;  %p2075_p5 = scmp.lt.u32.totalorder %s2071_s24, %s2830_s2 }
  0x56   :  { %p2077_p6 = pnand %p2075_p5, %p2072_p4 }
  0x58   :  { %2080 = shalt.err (!%p2077_p6)
}
  0x59   :  { %s2081_s19 = scalar_lea.vmem %s40_s23, 32  ;;  %p2086_p8 = scmp.lt.s32.totalorder %s40_s23, %s40_s23 }
  0x5a   :  { %p2082_p7 = scmp.ne.s32.totalorder %s40_s23, %s2081_s19  ;;  %p2087_p9 = scmp.lt.s32.totalorder %s2081_s19, %s2081_s19 }
  0x5c   :  { %p2088_p10 = por %p2087_p9, %p2086_p8 }
  0x5e   :  { %p2089_p11 = pnand %p2088_p10, %p2082_p7 }
  0x60   :  { %2092 = shalt.err (!%p2089_p11)
}
  0x61   :  { %s2246_s11 = smov 16   ;;  %s2247_s3 = smov 1  }
  0x62   :  { %45 = dma.hbm_to_vmem [thread:$0]  %s2830_s2, 32, %s40_s23, [#allocation4], %s2246_s11, %s2246_s11, %s2247_s3  }
  0x63   :  { %s2248_s27 = smov [#allocation8]   ;;  %s2249_s6 = smov [#allocation11]  }
  0x64   :  { %s61_s20 = sshll.u32 %s2248_s27, 4  ;;  %s88_s25 = sshll.u32 %s2249_s6, 4  ;;  %s62_s20 = int_to_ptr.vmem [resolvable:$true] %s61_s20  ;;  %s89_s25 = int_to_ptr.vmem [resolvable:$true] %s88_s25 }
  0x65   :  { %s2093_s26 = scalar_lea.hbm %s2809_s4, 256 }
  0x66   :  { %p2094_p12 = scmp.ne.s32.totalorder %s2809_s4, %s2093_s26  ;;  %p2097_p13 = scmp.lt.u32.totalorder %s2093_s26, %s2809_s4 }
  0x68   :  { %p2099_p0 = pnand %p2097_p13, %p2094_p12 }
  0x6a   :  { %2102 = shalt.err (!%p2099_p0)
}
  0x6b   :  { %s2103_s23 = scalar_lea.vmem %s62_s20, 256  ;;  %p2108_p2 = scmp.lt.s32.totalorder %s62_s20, %s62_s20 }
  0x6c   :  { %p2104_p1 = scmp.ne.s32.totalorder %s62_s20, %s2103_s23  ;;  %p2109_p3 = scmp.lt.s32.totalorder %s2103_s23, %s2103_s23 }
  0x6e   :  { %p2110_p4 = por %p2109_p3, %p2108_p2 }
  0x70   :  { %p2111_p5 = pnand %p2110_p4, %p2104_p1 }
  0x72   :  { %2114 = shalt.err (!%p2111_p5)
}
  0x73   :  { %67 = dma.hbm_to_vmem [thread:$0]  %s2809_s4, 256, %s62_s20, [#allocation7], %s2242_s28, %s2242_s28, %s2243_s22  }
  0x74   :  { %s2115_s27 = scalar_lea.hbm %s2812_s7, 16 }
  0x75   :  { %p2116_p6 = scmp.ne.s32.totalorder %s2812_s7, %s2115_s27  ;;  %p2119_p7 = scmp.lt.u32.totalorder %s2115_s27, %s2812_s7 }
  0x77   :  { %p2121_p8 = pnand %p2119_p7, %p2116_p6 }
  0x79   :  { %2124 = shalt.err (!%p2121_p8)
}
  0x7a   :  { %s2125_s29 = scalar_lea.vmem %s89_s25, 16  ;;  %s2129_s30 = scalar_lea.vmem %s89_s25, 32 }
  0x7b   :  { %p2126_p9 = scmp.ne.s32.totalorder %s89_s25, %s2125_s29  ;;  %p2130_p10 = scmp.lt.s32.totalorder %s89_s25, %s89_s25 }
  0x7c   :  { %p2131_p11 = scmp.lt.s32.totalorder %s2129_s30, %s2125_s29 }
  0x7e   :  { %p2132_p12 = por %p2131_p11, %p2130_p10 }
  0x80   :  { %p2133_p13 = pnand %p2132_p12, %p2126_p9 }
  0x82   :  { %2136 = shalt.err (!%p2133_p13)
}
  0x83   :  { %91 = dma.hbm_to_vmem [thread:$0]  %s2812_s7, 16, %s89_s25, [#allocation10]  }
  0x84   :  { %s2250_s22 = smov [#allocation14]   ;;  %s2251_s0 = smov [#allocation17]  }
  0x85   :  { %s110_s20 = sshll.u32 %s2250_s22, 4  ;;  %s132_s19 = sshll.u32 %s2251_s0, 4  ;;  %s111_s20 = int_to_ptr.vmem [resolvable:$true] %s110_s20  ;;  %s133_s19 = int_to_ptr.vmem [resolvable:$true] %s132_s19 }
  0x86   :  { %s2137_s3 = scalar_lea.hbm %s2814_s9, 16 }
  0x87   :  { %p2138_p0 = scmp.ne.s32.totalorder %s2814_s9, %s2137_s3  ;;  %p2141_p1 = scmp.lt.u32.totalorder %s2137_s3, %s2814_s9 }
  0x89   :  { %p2143_p2 = pnand %p2141_p1, %p2138_p0 }
  0x8b   :  { %2146 = shalt.err (!%p2143_p2)
}
  0x8c   :  { %s2147_s7 = scalar_lea.vmem %s111_s20, 16  ;;  %s2151_s25 = scalar_lea.vmem %s111_s20, 32 }
  0x8d   :  { %p2148_p3 = scmp.ne.s32.totalorder %s111_s20, %s2147_s7  ;;  %p2152_p4 = scmp.lt.s32.totalorder %s111_s20, %s111_s20 }
  0x8e   :  { %p2153_p5 = scmp.lt.s32.totalorder %s2151_s25, %s2147_s7 }
  0x90   :  { %p2154_p6 = por %p2153_p5, %p2152_p4 }
  0x92   :  { %p2155_p7 = pnand %p2154_p6, %p2148_p3 }
  0x94   :  { %2158 = shalt.err (!%p2155_p7)
}
  0x95   :  { %113 = dma.hbm_to_vmem [thread:$0]  %s2814_s9, 16, %s111_s20, [#allocation13]  }
  0x96   :  { %s2159_s30 = scalar_lea.hbm %s2817_s12, 16 }
  0x97   :  { %p2160_p8 = scmp.ne.s32.totalorder %s2817_s12, %s2159_s30  ;;  %p2163_p9 = scmp.lt.u32.totalorder %s2159_s30, %s2817_s12 }
  0x99   :  { %p2165_p10 = pnand %p2163_p9, %p2160_p8 }
  0x9b   :  { %2168 = shalt.err (!%p2165_p10)
}
  0x9c   :  { %s2169_s23 = scalar_lea.vmem %s133_s19, 16  ;;  %s2173_s2 = scalar_lea.vmem %s133_s19, 32 }
  0x9d   :  { %p2170_p11 = scmp.ne.s32.totalorder %s133_s19, %s2169_s23  ;;  %p2174_p12 = scmp.lt.s32.totalorder %s133_s19, %s133_s19 }
  0x9e   :  { %p2175_p13 = scmp.lt.s32.totalorder %s2173_s2, %s2169_s23 }
  0xa0   :  { %p2176_p0 = por %p2175_p13, %p2174_p12 }
  0xa2   :  { %p2177_p1 = pnand %p2176_p0, %p2170_p11 }
  0xa4   :  { %2180 = shalt.err (!%p2177_p1)
}
  0xa5   :  { %135 = dma.hbm_to_vmem [thread:$0]  %s2817_s12, 16, %s133_s19, [#allocation16]  }
  0xa6   :  { %s2252_s3 = smov [#allocation18]   ;;  %s2181_s6 = scalar_lea.hbm %s2818_s13, 16 }
  0xa7   :  { %s142_s1 = sshll.u32 %s2252_s3, 4  ;;  %p2182_p2 = scmp.ne.s32.totalorder %s2818_s13, %s2181_s6  ;;  %s143_s1 = int_to_ptr.vmem [resolvable:$true] %s142_s1 }
  0xa8   :  { %p2185_p3 = scmp.lt.u32.totalorder %s2181_s6, %s2818_s13 }
  0xaa   :  { %p2187_p4 = pnand %p2185_p3, %p2182_p2 }
  0xac   :  { %2190 = shalt.err (!%p2187_p4)
}
  0xad   :  { %s2191_s26 = scalar_lea.vmem %s143_s1, 16  ;;  %s2195_s12 = scalar_lea.vmem %s143_s1, 32 }
  0xae   :  { %p2192_p5 = scmp.ne.s32.totalorder %s143_s1, %s2191_s26  ;;  %p2196_p6 = scmp.lt.s32.totalorder %s143_s1, %s143_s1 }
  0xaf   :  { %p2197_p7 = scmp.lt.s32.totalorder %s2195_s12, %s2191_s26 }
  0xb1   :  { %p2198_p8 = por %p2197_p7, %p2196_p6 }
  0xb3   :  { %p2199_p9 = pnand %p2198_p8, %p2192_p5 }
  0xb5   :  { %2202 = shalt.err (!%p2199_p9)
}
  0xb6   :  { %145 = dma.hbm_to_vmem [thread:$0]  %s2818_s13, 16, %s143_s1, [#allocation19]  }
  0xb7   :  { %2225 = dma.done.wait [#allocation4], 32  }
  0xb8   :  { %2226 = vsyncadd [#allocation4], 4294967264 }
  0xb9   :  { %2227 = dma.done.wait [#allocation7], 384  }
  0xba   :  { %2228 = vsyncadd [#allocation7], 4294966912 }
  0xbb   :  { %2229 = dma.done.wait [#allocation10], 272  }
  0xbc   :  { %2230 = vsyncadd [#allocation10], 4294967024 }
  0xbd   :  { %2231 = dma.done.wait [#allocation13], 272  }
  0xbe   :  { %2232 = vsyncadd [#allocation13], 4294967024 }
  0xbf   :  { %2233 = dma.done.wait [#allocation16], 32  }
  0xc0   :  { %2234 = vsyncadd [#allocation16], 4294967264 }
  0xc1   :  { %2235 = dma.done.wait [#allocation19], 16  }
  0xc2   :  { %2236 = vsyncadd [#allocation19], 4294967280  ;;  %v2253_v0 = vmov 0.0   ;;  %vm2254_vm0 = vmmov 0   ;;  %v1929_v1 = vld [vmem:[#allocation9] sm:$0xff]   ;;  %v1930_v2 = vld [vmem:[#allocation9 + $0x8] sm:$0xff]  }
  0xc3   :  { %1758 = vmatprep.subr.bf16.mxu0 %v2253_v0  ;;  %1762 = vmatprep.mubr.msk.bf16.mxu0 %vm2254_vm0, %v2253_v0  ;;  %v1931_v3 = vld [vmem:[#allocation8] sm:$0xff]   ;;  %s2831_s4 = sld [smem:[#allocation29_spill]]  ;;  %vm217_vm1 = vcmask 261120   ;;  %v1932_v9 = vld [vmem:[#allocation8 + $0x8] sm:$0xff]   ;;  %s2832_s1 = sld [smem:[#allocation28_spill]]  ;;  %vm435_vm2 = vcmask 64512  }
  0xc4   :  { %1766 = vmatprep.subr.bf16.mxu1 %v1929_v1  ;;  %1759 = vmatpush3.bf16.msra.mxu0 %v1931_v3  ;;  %v1933_v13 = vld [vmem:[#allocation12] sm:$0xff]   ;;  %v1934_v15 = vld [vmem:[#allocation12 + $0x8] sm:$0xff]   ;;  %v1660_v17 = vld [vmem:[#allocation11] ss:$0 sm:$0xff]  ;;  %s2255_s25 = smov 120   ;;  %vm528_vm3 = vcmask 130048  }
  0xc5   :  { %1767 = vmatpush3.bf16.msra.mxu1 %v1929_v1  ;;  %1760 = vmatprep.subr.bf16.mxu0 %v2253_v0  ;;  %v1656_v28 = vld [vmem:[%s2810_s5] ss:$0 sm:$0xff]  ;;  %v1665_v36 = vld [vmem:[#allocation14] ss:$0 sm:$0xff]  ;;  %s2256_s5 = smov 112   ;;  %v420_v49 = vld [vmem:[#allocation6] sm:$0xff] }
  0xc6   :  { %1768 = vmatprep.subr.bf16.mxu1 %v1930_v2  ;;  %v1670_v50 = vld [vmem:[#allocation3] ss:$0 sm:$0xff]  ;;  %v1671_v51 = vld [vmem:[#allocation3 + $0x1] ss:$0 sm:$0xff]  ;;  %s2257_s21 = smov 104   ;;  %s2258_s24 = smov 8  }
  0xc7   :  { %v2572_v52 = vadd.f32 %v1670_v50, %v420_v49  ;;  %v2574_v53 = vadd.f32 %v1671_v51, %v420_v49  ;;  %vm871_vm4 = vcmask 130112   ;;  %vm1098_vm5 = vcmask 195712   ;;  %s2259_s29 = smov 24  }
  0xc8   :  { %1761 = vmatpush3.bf16.msra.mxu0 %v1932_v9  ;;  %vm1325_vm6 = vcmask 261312   ;;  %vm1555_vm7 = vcmask 523264  }
  0xc9   :  { %v188_v4 = vld [vmem:[%s2831_s4] sm:$0xff]  ;;  %v189_v5 = vld [vmem:[%s2831_s4 + $0x8] sm:$0xff]  ;;  %v190_v6 = vld [vmem:[%s2831_s4 + $0x10] sm:$0xff]  ;;  %1769 = vmatpush3.bf16.msra.mxu1 %v1930_v2  ;;  %1774 = vmatprep.subr.bf16.mxu0 %v1933_v13 }
  0xca   :  { %v192_v7 = vpack.c.bf16 %v189_v5, %v188_v4  ;;  %v191_v8 = vld [vmem:[%s2831_s4 + $0x18] sm:$0xff]  ;;  %v2507_v10 = vld [vmem:[%s2832_s1] sm:$0xff]  ;;  %v2512_v11 = vld [vmem:[%s2832_s1 + $0x8] sm:$0xff]  ;;  %1782 = vmatprep.subr.bf16.mxu1 %v2253_v0 }
  0xcb   :  { %v193_v12 = vpack.c.bf16 %v191_v8, %v190_v6  ;;  %v187_v14 = vpack.c.bf16 %v2512_v11, %v2507_v10 }
  0xcc   :  { %1770 = vmatprep.mubr.msk.bf16.mxu1 %vm217_vm1, %v192_v7 }
  0xcd   :  { %1771 = vmatmul.mubr.msk.bf16.vlgmr.msra.gmra.mrb[0].mxu1 %vm217_vm1, %v193_v12  ;;  %1763 = vmatmul.mubr.msk.bf16.vlgmr.msra.gmra.mrb[0].mxu0 %vm217_vm1, %v187_v14 }
  0xce   :  { %1784 = vmatprep.mubr.msk.bf16.mxu1 %vm2254_vm0, %v2253_v0  ;;  %1775 = vmatpush3.bf16.msra.mxu0 %v1933_v13 }
  0xcf   :  { %1778 = vmatprep.mubr.msk.bf16.mxu0 %vm217_vm1, %v192_v7  ;;  %1776 = vmatprep.subr.bf16.mxu0 %v1934_v15 }
  0xd2   :  { %1777 = vmatpush3.bf16.msra.mxu0 %v1934_v15 }
  0xd3   :  { %1788 = vmatprep.subr.bf16.mxu0 %v2253_v0 }
  0xd5   :  { %1779 = vmatmul.mubr.msk.bf16.vlgmr.msra.gmra.mrb[4].mxu0 %vm217_vm1, %v193_v12 }
  0xd6   :  { %1790 = vmatprep.mubr.msk.bf16.mxu0 %vm2254_vm0, %v2253_v0 }
 0x1a0   :  { %v1772_v16 = vpop.f32.mrb[0].mxu1  ;;  %v255_v19 = vpop.f32.mrb[0].mxu0 }
 0x1a1   :  { %v325_v18 = vpop.f32.mrb[1].mxu1  ;;  %v1764_v21 = vpop.f32.mrb[1].mxu0  ;;  %v334_v22 = vadd.f32 %v1772_v16, %v1660_v17  ;;  %v256_v34 = vadd.f32 %v1656_v28, %v255_v19 }
 0x1a2   :  { %v1773_v20 = vpop.f32.mrb[2].mxu1  ;;  %v258_v25 = vpop.f32.mrb[2].mxu0  ;;  %v326_v26 = vadd.f32 %v1660_v17, %v325_v18 }
 0x1a3   :  { %v337_v23 = vadd.f32 %v1773_v20, %v1660_v17  ;;  %v328_v24 = vpop.f32.mrb[3].mxu1  ;;  %v1765_v29 = vpop.f32.mrb[3].mxu0  ;;  %v259_v33 = vadd.f32 %v1656_v28, %v258_v25  ;;  %v2544_v43 = vpack.c.bf16 %v256_v34, %v256_v34 }
 0x1a4   :  { %v329_v27 = vadd.f32 %v1660_v17, %v328_v24 }
 0x1a5   :  { %v2530_v30 = vpack.c.bf16 %v337_v23, %v334_v22  ;;  %v2542_v40 = vpack.c.bf16 %v259_v33, %v259_v33 }
 0x1a6   :  { %v2532_v31 = vpack.c.bf16 %v329_v27, %v326_v26 }
 0x1a7   :  { %v486_v32 = vsel %vm435_vm2, %v2530_v30, 0 }
 0x1a8   :  { %645 = vrot.lane.b32.xlu1 %v2532_v31, %s2255_s25  ;;  %1789 = vmatpush3.bf16.xpose.msra.mxu0 %v486_v32  ;;  %v440_v35 = vsel %vm435_vm2, %v2532_v31, 0  ;;  %v1780_v37 = vpop.f32.mrb[4].mxu0 }
 0x1a9   :  { %1783 = vmatpush3.bf16.xpose.msra.mxu1 %v440_v35  ;;  %1800 = vmatprep.subr.bf16.mxu0 %v2253_v0  ;;  %v406_v38 = vadd.f32 %v1780_v37, %v1665_v36  ;;  %v397_v39 = vpop.f32.mrb[5].mxu0 }
 0x1aa   :  { %1794 = vmatprep.subr.bf16.mxu1 %v2253_v0  ;;  %v398_v41 = vadd.f32 %v1665_v36, %v397_v39  ;;  %v1781_v42 = vpop.f32.mrb[6].mxu0 }
 0x1ab   :  { %v409_v44 = vadd.f32 %v1781_v42, %v1665_v36  ;;  %v400_v45 = vpop.f32.mrb[7].mxu0 }
 0x1ac   :  { %697 = vrot.lane.b32.xlu1 %v2530_v30, %s2255_s25  ;;  %v401_v46 = vadd.f32 %v1665_v36, %v400_v45 }
 0x1ad   :  { %v2548_v47 = vpack.c.bf16 %v409_v44, %v406_v38 }
 0x1ae   :  { %v2550_v48 = vpack.c.bf16 %v401_v46, %v398_v41 }
 0x1af   :  { %1791 = vmatmul.mubr.msk.bf16.vlgmr.msra.gmra.mrb[8].mxu0 %vm435_vm2, %v2542_v40 }
 0x1b0   :  { %1785 = vmatmul.mubr.msk.bf16.vlgmr.msra.gmra.mrb[4].mxu1 %vm435_vm2, %v2544_v43  ;;  %694 = vrot.lane.b32.xlu1 %v2542_v40, %s2255_s25 }
 0x1b1   :  { %1795 = vmatpush3.bf16.msra.mxu1 %v2550_v48  ;;  %1801 = vmatpush3.bf16.msra.mxu0 %v2548_v47 }
 0x1b2   :  { %1796 = vmatprep.mubr.msk.bf16.mxu1 %vm2254_vm0, %v2253_v0  ;;  %1806 = vmatprep.subr.bf16.mxu1 %v2253_v0 }
 0x1b3   :  { %1802 = vmatprep.mubr.msk.bf16.mxu0 %vm2254_vm0, %v2253_v0  ;;  %1812 = vmatprep.subr.bf16.mxu0 %v2253_v0 }
 0x1b4   :  { %766 = vrot.lane.b32.xlu1 %v2550_v48, %s2255_s25 }
 0x1b8   :  { %876 = vrot.lane.b32.xlu1 %v2532_v31, %s2256_s5 }
 0x1bc   :  { %926 = vrot.lane.b32.xlu1 %v2530_v30, %s2256_s5 }
 0x21a   :  { %v646_v9 = vpop.permute.xlu1 %645 }
 0x21b   :  { %v651_v15 = vsel %vm435_vm2, %v646_v9, 0 }
 0x21e   :  { %v698_v12 = vpop.permute.xlu1 %697 }
 0x21f   :  { %v703_v19 = vsel %vm435_vm2, %v698_v12, 0 }
 0x222   :  { %v695_v17 = vpop.permute.xlu1 %694 }
 0x226   :  { %v767_v21 = vpop.permute.xlu1 %766 }
 0x22a   :  { %v877_v46 = vpop.permute.xlu1 %876 }
 0x22e   :  { %v927_v49 = vpop.permute.xlu1 %926 }
 0x282   :  { %v522_v54 = vpop.f32.mrb[8].mxu0 }
 0x283   :  { %v476_v55 = vpop.f32.mrb[4].mxu1  ;;  %v1792_v56 = vpop.f32.mrb[9].mxu0  ;;  %v523_v62 = vadd.f32 %v522_v54, %v2574_v53 }
 0x284   :  { %v477_v57 = vadd.f32 %v476_v55, %v2572_v52  ;;  %v1786_v58 = vpop.f32.mrb[5].mxu1  ;;  %v525_v59 = vpop.f32.mrb[10].mxu0 }
 0x285   :  { %v479_v60 = vpop.f32.mrb[6].mxu1  ;;  %v1793_v61 = vpop.f32.mrb[11].mxu0  ;;  %v532_v2 = vsel %vm528_vm3, %v523_v62, -inf }
 0x286   :  { %v1787_v63 = vpop.f32.mrb[7].mxu1  ;;  %v529_v1 = vsel %vm528_vm3, %v477_v57, -inf  ;;  %v882_v61 = vsel %vm435_vm2, %v877_v46, 0 }
 0x287   :  { %530 = vmax.xlane.f32.xlu0 %v529_v1 }
 0x28b   :  { %533 = vmax.xlane.f32.xlu0 %v532_v2  ;;  %v932_v2 = vsel %vm435_vm2, %v927_v49, 0 }
 0x2a1   :  { %642 = vrot.lane.b32.xlu0 %v2544_v43, %s2255_s25 }
 0x314   :  { %v531_v3 = vpop.xlane.xlu0 %530 }
 0x315   :  { %v535_v4 = vsub.f32 %v477_v57, %v531_v3 }
 0x317   :  { %v537_v5 = vmul.f32 1.442695, %v535_v4 }
 0x318   :  { %v534_v6 = vpop.xlane.xlu0 %533 }
 0x319   :  { %1943 = vpow2.f32 %v537_v5  ;;  %v536_v7 = vsub.f32 %v523_v62, %v534_v6 }
 0x31b   :  { %v539_v8 = vmul.f32 1.442695, %v536_v7 }
 0x31c   :  { %v643_v20 = vpop.permute.xlu0 %642 }
 0x31d   :  { %1945 = vpow2.f32 %v539_v8 }
 0x323   :  { %v2582_v13 = vpop.eup %1943 }
 0x324   :  { %v547_v14 = vpack.c.bf16 %v2582_v13, %v2582_v13 }
 0x326   :  { %1797 = vmatmul.mubr.msk.bf16.vlgmr.msra.gmra.mrb[8].mxu1 %vm528_vm3, %v547_v14 }
 0x327   :  { %v2588_v16 = vpop.eup %1945  ;;  %1807 = vmatpush3.bf16.xpose.msra.mxu1 %v651_v15  ;;  %1808 = vmatprep.mubr.msk.bf16.mxu1 %vm2254_vm0, %v2253_v0 }
 0x328   :  { %v548_v18 = vpack.c.bf16 %v2588_v16, %v2588_v16  ;;  %1818 = vmatprep.subr.bf16.mxu1 %v2253_v0 }
 0x32a   :  { %1803 = vmatmul.mubr.msk.bf16.vlgmr.msra.gmra.mrb[12].mxu0 %vm528_vm3, %v548_v18 }
 0x32b   :  { %1813 = vmatpush3.bf16.xpose.msra.mxu0 %v703_v19  ;;  %1814 = vmatprep.mubr.msk.bf16.mxu0 %vm2254_vm0, %v2253_v0 }
 0x32c   :  { %1824 = vmatprep.subr.bf16.mxu0 %v2253_v0 }
 0x32e   :  { %1809 = vmatmul.mubr.msk.bf16.vlgmr.msra.gmra.mrb[12].mxu1 %vm435_vm2, %v643_v20 }
 0x32f   :  { %1819 = vmatpush3.bf16.msra.mxu1 %v767_v21  ;;  %1820 = vmatprep.mubr.msk.bf16.mxu1 %vm2254_vm0, %v2253_v0 }
 0x330   :  { %1830 = vmatprep.subr.bf16.mxu1 %v2253_v0 }
 0x332   :  { %1815 = vmatmul.mubr.msk.bf16.vlgmr.msra.gmra.mrb[16].mxu0 %vm435_vm2, %v695_v17 }
 0x333   :  { %1826 = vmatprep.mubr.msk.bf16.mxu0 %vm2254_vm0, %v2253_v0 }
 0x3f9   :  { %v2607_v22 = vpop.f32.mrb[8].mxu1 }
 0x3fa   :  { %v1798_v23 = vpop.f32.mrb[9].mxu1 }
 0x3fb   :  { %v589_v24 = vpop.f32.mrb[10].mxu1 }
 0x3fc   :  { %v1799_v25 = vpop.f32.mrb[11].mxu1 }
 0x3fd   :  { %v2609_v26 = vpop.f32.mrb[12].mxu0 }
 0x3fe   :  { %v1804_v27 = vpop.f32.mrb[13].mxu0 }
 0x3ff   :  { %v632_v28 = vpop.f32.mrb[14].mxu0 }
 0x400   :  { %v1805_v29 = vpop.f32.mrb[15].mxu0 }
 0x401   :  { %v687_v32 = vpop.f32.mrb[12].mxu1 }
 0x402   :  { %v688_v33 = vadd.f32 %v687_v32, %v2572_v52  ;;  %v1810_v34 = vpop.f32.mrb[13].mxu1 }
 0x403   :  { %v690_v35 = vpop.f32.mrb[14].mxu1 }
 0x404   :  { %v1811_v36 = vpop.f32.mrb[15].mxu1  ;;  %v745_v37 = vsel %vm528_vm3, %v688_v33, -inf }
 0x405   :  { %v739_v38 = vpop.f32.mrb[16].mxu0  ;;  %746 = vmax.xlane.f32.xlu1 %v745_v37 }
 0x406   :  { %v740_v39 = vadd.f32 %v739_v38, %v2574_v53  ;;  %v1816_v41 = vpop.f32.mrb[17].mxu0 }
 0x407   :  { %v742_v42 = vpop.f32.mrb[18].mxu0 }
 0x408   :  { %v1817_v44 = vpop.f32.mrb[19].mxu0  ;;  %v748_v45 = vsel %vm528_vm3, %v740_v39, -inf }
 0x409   :  { %749 = vmax.xlane.f32.xlu0 %v748_v45 }
 0x416   :  { %874 = vrot.lane.b32.xlu1 %v2544_v43, %s2256_s5 }
 0x41a   :  { %924 = vrot.lane.b32.xlu1 %v2542_v40, %s2256_s5 }
 0x41e   :  { %1040 = vrot.lane.b32.xlu1 %v2548_v47, %s2256_s5 }
 0x41f   :  { %813 = vrot.lane.b32.xlu0 %v2548_v47, %s2255_s25 }
 0x423   :  { %994 = vrot.lane.b32.xlu0 %v2550_v48, %s2256_s5 }
 0x492   :  { %v747_v50 = vpop.xlane.xlu1 %746 }
 0x493   :  { %v751_v51 = vsub.f32 %v688_v33, %v747_v50 }
 0x495   :  { %v753_v54 = vmul.f32 1.442695, %v751_v51 }
 0x496   :  { %v750_v55 = vpop.xlane.xlu0 %749  ;;  %v875_v62 = vpop.permute.xlu1 %874 }
 0x497   :  { %1947 = vpow2.f32 %v753_v54  ;;  %v752_v56 = vsub.f32 %v740_v39, %v750_v55 }
 0x499   :  { %v755_v57 = vmul.f32 1.442695, %v752_v56 }
 0x49a   :  { %v814_v58 = vpop.permute.xlu0 %813  ;;  %v925_v3 = vpop.permute.xlu1 %924 }
 0x49b   :  { %1949 = vpow2.f32 %v755_v57  ;;  %1825 = vmatpush3.bf16.msra.mxu0 %v814_v58 }
 0x49c   :  { %1836 = vmatprep.subr.bf16.mxu0 %v2253_v0 }
 0x49e   :  { %v995_v4 = vpop.permute.xlu0 %994  ;;  %v1041_v5 = vpop.permute.xlu1 %1040 }
 0x4a1   :  { %v2626_v59 = vpop.eup %1947 }
 0x4a2   :  { %v763_v60 = vpack.c.bf16 %v2626_v59, %v2626_v59 }
 0x4a4   :  { %1821 = vmatmul.mubr.msk.bf16.vlgmr.msra.gmra.mrb[16].mxu1 %vm528_vm3, %v763_v60 }
 0x4a5   :  { %v2632_v63 = vpop.eup %1949  ;;  %1831 = vmatpush3.bf16.xpose.msra.mxu1 %v882_v61  ;;  %1832 = vmatprep.mubr.msk.bf16.mxu1 %vm2254_vm0, %v2253_v0 }
 0x4a6   :  { %v764_v1 = vpack.c.bf16 %v2632_v63, %v2632_v63  ;;  %1842 = vmatprep.subr.bf16.mxu1 %v2253_v0 }
 0x4a8   :  { %1827 = vmatmul.mubr.msk.bf16.vlgmr.msra.gmra.mrb[20].mxu0 %vm528_vm3, %v764_v1 }
 0x4a9   :  { %1837 = vmatpush3.bf16.xpose.msra.mxu0 %v932_v2  ;;  %1838 = vmatprep.mubr.msk.bf16.mxu0 %vm2254_vm0, %v2253_v0 }
 0x4aa   :  { %1848 = vmatprep.subr.bf16.mxu0 %v2253_v0 }
 0x4ac   :  { %1833 = vmatmul.mubr.msk.bf16.vlgmr.msra.gmra.mrb[20].mxu1 %vm435_vm2, %v875_v62 }
 0x4ad   :  { %1843 = vmatpush3.bf16.msra.mxu1 %v995_v4  ;;  %1844 = vmatprep.mubr.msk.bf16.mxu1 %vm2254_vm0, %v2253_v0 }
 0x4ae   :  { %1854 = vmatprep.subr.bf16.mxu1 %v2253_v0 }
 0x4b0   :  { %1839 = vmatmul.mubr.msk.bf16.vlgmr.msra.gmra.mrb[24].mxu0 %vm435_vm2, %v925_v3 }
 0x4b1   :  { %1849 = vmatpush3.bf16.msra.mxu0 %v1041_v5  ;;  %1850 = vmatprep.mubr.msk.bf16.mxu0 %vm2254_vm0, %v2253_v0 }
 0x4b2   :  { %1860 = vmatprep.subr.bf16.mxu0 %v2253_v0 }
 0x577   :  { %v2652_v6 = vpop.f32.mrb[16].mxu1 }
 0x578   :  { %v1822_v7 = vpop.f32.mrb[17].mxu1 }
 0x579   :  { %v809_v8 = vpop.f32.mrb[18].mxu1 }
 0x57a   :  { %v1823_v9 = vpop.f32.mrb[19].mxu1 }
 0x57b   :  { %v2654_v12 = vpop.f32.mrb[20].mxu0 }
 0x57c   :  { %v1828_v14 = vpop.f32.mrb[21].mxu0 }
 0x57d   :  { %v856_v15 = vpop.f32.mrb[22].mxu0 }
 0x57e   :  { %v1829_v17 = vpop.f32.mrb[23].mxu0 }
 0x57f   :  { %v918_v18 = vpop.f32.mrb[20].mxu1  ;;  %v760_v17 = vsel %vm528_vm3, %v2632_v63, 0.0 }
 0x580   :  { %v919_v19 = vadd.f32 %v918_v18, %v2572_v52  ;;  %v1834_v20 = vpop.f32.mrb[21].mxu1 }
 0x581   :  { %v921_v21 = vpop.f32.mrb[22].mxu1 }
 0x582   :  { %v1835_v23 = vpop.f32.mrb[23].mxu1  ;;  %v974_v24 = vsel %vm528_vm3, %v919_v19, -inf }
 0x583   :  { %v968_v25 = vpop.f32.mrb[24].mxu0  ;;  %975 = vmax.xlane.f32.xlu1 %v974_v24 }
 0x584   :  { %v969_v27 = vadd.f32 %v968_v25, %v2574_v53  ;;  %v1840_v28 = vpop.f32.mrb[25].mxu0 }
 0x585   :  { %v971_v29 = vpop.f32.mrb[26].mxu0 }
 0x586   :  { %v1841_v32 = vpop.f32.mrb[27].mxu0  ;;  %v977_v33 = vsel %vm528_vm3, %v969_v27, -inf }
 0x587   :  { %978 = vmax.xlane.f32.xlu0 %v977_v33  ;;  %v541_v32 = vsel %vm528_vm3, %v2582_v13, 0.0 }
 0x594   :  { %1103 = vrot.lane.b32.xlu1 %v2532_v31, %s2257_s21 }
 0x598   :  { %1101 = vrot.lane.b32.xlu1 %v2544_v43, %s2257_s21 }
 0x59d   :  { %1153 = vrot.lane.b32.xlu0 %v2530_v30, %s2257_s21 }
 0x5a1   :  { %1151 = vrot.lane.b32.xlu0 %v2542_v40, %s2257_s21 }
 0x610   :  { %v976_v34 = vpop.xlane.xlu1 %975 }
 0x611   :  { %v980_v35 = vsub.f32 %v919_v19, %v976_v34  ;;  %v544_v34 = vsel %vm528_vm3, %v2588_v16, 0.0 }
 0x613   :  { %v982_v36 = vmul.f32 1.442695, %v980_v35 }
 0x614   :  { %v979_v37 = vpop.xlane.xlu0 %978  ;;  %v1104_v42 = vpop.permute.xlu1 %1103 }
 0x615   :  { %1951 = vpow2.f32 %v982_v36  ;;  %v981_v38 = vsub.f32 %v969_v27, %v979_v37  ;;  %v1109_v44 = vsel %vm435_vm2, %v1104_v42, 0 }
 0x617   :  { %v984_v39 = vmul.f32 1.442695, %v981_v38 }
 0x618   :  { %v1154_v30 = vpop.permute.xlu0 %1153  ;;  %v1102_v46 = vpop.permute.xlu1 %1101 }
 0x619   :  { %1953 = vpow2.f32 %v984_v39  ;;  %v1159_v45 = vsel %vm435_vm2, %v1154_v30, 0 }
 0x61c   :  { %v1152_v49 = vpop.permute.xlu0 %1151 }
 0x61f   :  { %v1952_v41 = vpop.eup %1951 }
 0x620   :  { %v992_v31 = vpack.c.bf16 %v1952_v41, %v1952_v41  ;;  %v986_v18 = vsel %vm528_vm3, %v1952_v41, 0.0 }
 0x622   :  { %1845 = vmatmul.mubr.msk.bf16.vlgmr.msra.gmra.mrb[24].mxu1 %vm528_vm3, %v992_v31 }
 0x623   :  { %v1954_v43 = vpop.eup %1953  ;;  %1855 = vmatpush3.bf16.xpose.msra.mxu1 %v1109_v44  ;;  %1856 = vmatprep.mubr.msk.bf16.mxu1 %vm2254_vm0, %v2253_v0 }
 0x624   :  { %v993_v40 = vpack.c.bf16 %v1954_v43, %v1954_v43  ;;  %1866 = vmatprep.subr.bf16.mxu1 %v2253_v0 }
 0x626   :  { %1851 = vmatmul.mubr.msk.bf16.vlgmr.msra.gmra.mrb[28].mxu0 %vm528_vm3, %v993_v40 }
 0x627   :  { %1861 = vmatpush3.bf16.xpose.msra.mxu0 %v1159_v45  ;;  %1862 = vmatprep.mubr.msk.bf16.mxu0 %vm2254_vm0, %v2253_v0 }
 0x628   :  { %1872 = vmatprep.subr.bf16.mxu0 %v2253_v0 }
 0x62a   :  { %1857 = vmatmul.mubr.msk.bf16.vlgmr.msra.gmra.mrb[28].mxu1 %vm435_vm2, %v1102_v46 }
 0x62b   :  { %1868 = vmatprep.mubr.msk.bf16.mxu1 %vm2254_vm0, %v2253_v0 }
 0x62e   :  { %1863 = vmatmul.mubr.msk.bf16.vlgmr.msra.gmra.mrb[32].mxu0 %vm435_vm2, %v1152_v49 }
 0x62f   :  { %1874 = vmatprep.mubr.msk.bf16.mxu0 %vm2254_vm0, %v2253_v0 }
 0x6f5   :  { %v2684_v50 = vpop.f32.mrb[24].mxu1 }
 0x6f6   :  { %v1846_v51 = vpop.f32.mrb[25].mxu1 }
 0x6f7   :  { %v1037_v54 = vpop.f32.mrb[26].mxu1 }
 0x6f8   :  { %v1847_v55 = vpop.f32.mrb[27].mxu1 }
 0x6f9   :  { %v2686_v56 = vpop.f32.mrb[28].mxu0 }
 0x6fa   :  { %v1852_v57 = vpop.f32.mrb[29].mxu0 }
 0x6fb   :  { %v1083_v58 = vpop.f32.mrb[30].mxu0 }
 0x6fc   :  { %v1853_v60 = vpop.f32.mrb[31].mxu0 }
 0x6fd   :  { %v1145_v61 = vpop.f32.mrb[28].mxu1 }
 0x6fe   :  { %v1146_v62 = vadd.f32 %v1145_v61, %v2572_v52  ;;  %v1858_v1 = vpop.f32.mrb[29].mxu1  ;;  %v757_v52 = vsel %vm528_vm3, %v2626_v59, 0.0 }
 0x6ff   :  { %v1148_v2 = vpop.f32.mrb[30].mxu1 }
 0x700   :  { %v1859_v3 = vpop.f32.mrb[31].mxu1  ;;  %v1201_v4 = vsel %vm528_vm3, %v1146_v62, -inf }
 0x701   :  { %v1195_v5 = vpop.f32.mrb[32].mxu0  ;;  %1202 = vmax.xlane.f32.xlu1 %v1201_v4 }
 0x702   :  { %v1196_v7 = vadd.f32 %v1195_v5, %v2574_v53  ;;  %v1864_v8 = vpop.f32.mrb[33].mxu0  ;;  %v989_v53 = vsel %vm528_vm3, %v1954_v43, 0.0 }
 0x703   :  { %v1198_v9 = vpop.f32.mrb[34].mxu0 }
 0x704   :  { %v1865_v14 = vpop.f32.mrb[35].mxu0  ;;  %v1204_v15 = vsel %vm528_vm3, %v1196_v7, -inf }
 0x705   :  { %1205 = vmax.xlane.f32.xlu0 %v1204_v15 }
 0x712   :  { %1267 = vrot.lane.b32.xlu1 %v2548_v47, %s2257_s21 }
 0x71b   :  { %1221 = vrot.lane.b32.xlu0 %v2550_v48, %s2257_s21 }
 0x736   :  { %758 = vadd.xlane.f32.xlu1 %v757_v52 }
 0x73a   :  { %761 = vadd.xlane.f32.xlu0 %v760_v17  ;;  %990 = vadd.xlane.f32.xlu1 %v989_v53  ;;  %v1688_v53 = vld [vmem:[#allocation15] ss:$0 sm:$0xff] }
 0x73e   :  { %987 = vadd.xlane.f32.xlu0 %v986_v18 }
 0x78e   :  { %v1203_v19 = vpop.xlane.xlu1 %1202 }
 0x78f   :  { %v1207_v20 = vsub.f32 %v1146_v62, %v1203_v19 }
 0x791   :  { %v1209_v47 = vmul.f32 1.442695, %v1207_v20 }
 0x792   :  { %v1206_v21 = vpop.xlane.xlu0 %1205  ;;  %v1268_v23 = vpop.permute.xlu1 %1267 }
 0x793   :  { %1955 = vpow2.f32 %v1209_v47  ;;  %v1208_v48 = vsub.f32 %v1196_v7, %v1206_v21  ;;  %1873 = vmatpush3.bf16.msra.mxu0 %v1268_v23 }
 0x794   :  { %1886 = vmatprep.subr.bf16.mxu0 %v2253_v0 }
 0x795   :  { %v1211_v59 = vmul.f32 1.442695, %v1208_v48 }
 0x796   :  { %v1222_v24 = vpop.permute.xlu0 %1221 }
 0x797   :  { %1957 = vpow2.f32 %v1211_v59  ;;  %1867 = vmatpush3.bf16.msra.mxu1 %v1222_v24 }
 0x798   :  { %1878 = vmatprep.subr.bf16.mxu1 %v2253_v0 }
 0x79d   :  { %v1956_v63 = vpop.eup %1955 }
 0x79e   :  { %v1213_v25 = vsel %vm528_vm3, %v1956_v63, 0.0  ;;  %v1219_v27 = vpack.c.bf16 %v1956_v63, %v1956_v63 }
 0x79f   :  { %1214 = vadd.xlane.f32.xlu0 %v1213_v25 }
 0x7a0   :  { %1869 = vmatmul.mubr.msk.bf16.vlgmr.msra.gmra.mrb[32].mxu1 %vm528_vm3, %v1219_v27 }
 0x7a1   :  { %v1958_v28 = vpop.eup %1957  ;;  %1882 = vmatprep.mubr.msk.bf16.mxu1 %vm2254_vm0, %v2253_v0 }
 0x7a2   :  { %v1216_v29 = vsel %vm528_vm3, %v1958_v28, 0.0  ;;  %v1220_v33 = vpack.c.bf16 %v1958_v28, %v1958_v28 }
 0x7a3   :  { %1217 = vadd.xlane.f32.xlu1 %v1216_v29  ;;  %542 = vadd.xlane.f32.xlu0 %v541_v32 }
 0x7a4   :  { %1875 = vmatmul.mubr.msk.bf16.vlgmr.msra.gmra.mrb[36].mxu0 %vm528_vm3, %v1220_v33 }
 0x7a5   :  { %1890 = vmatprep.mubr.msk.bf16.mxu0 %vm2254_vm0, %v2253_v0 }
 0x7a7   :  { %545 = vadd.xlane.f32.xlu1 %v544_v34 }
 0x7c3   :  { %v759_v35 = vpop.xlane.xlu1 %758 }
 0x7c4   :  { %1959 = vrcp.f32 %v759_v35 }
 0x7c7   :  { %v762_v36 = vpop.xlane.xlu0 %761  ;;  %v991_v37 = vpop.xlane.xlu1 %990 }
 0x7c8   :  { %1961 = vrcp.f32 %v762_v36 }
 0x7c9   :  { %1963 = vrcp.f32 %v991_v37  ;;  %v1938_v37 = vld [vmem:[%s2819_s14 + $0x8] sm:$0xff]  }
 0x7cb   :  { %v988_v38 = vpop.xlane.xlu0 %987 }
 0x7cc   :  { %1965 = vrcp.f32 %v988_v38  ;;  %v1939_v38 = vld [vmem:[%s2821_s16] sm:$0xff]  }
 0x7ce   :  { %v1960_v13 = vpop.eup %1959 }
 0x7cf   :  { %v861_v39 = vmul.f32 %v1960_v13, %v2652_v6  ;;  %v1940_v13 = vld [vmem:[%s2821_s16 + $0x8] sm:$0xff]  }
 0x7d1   :  { %865 = vrot.lane.b32.xlu0 %v861_v39, %s2258_s24 }
 0x7d2   :  { %v1962_v41 = vpop.eup %1961 }
 0x7d3   :  { %v1964_v42 = vpop.eup %1963  ;;  %v862_v31 = vmul.f32 %v1962_v41, %v2654_v12 }
 0x7d4   :  { %v1089_v16 = vmul.f32 %v1964_v42, %v2686_v56 }
 0x7d5   :  { %867 = vrot.lane.b32.xlu1 %v862_v31, %s2258_s24 }
 0x7d6   :  { %v1966_v44 = vpop.eup %1965  ;;  %1094 = vrot.lane.b32.xlu0 %v1089_v16, %s2246_s11 }
 0x7d7   :  { %v1088_v43 = vmul.f32 %v1966_v44, %v2684_v50 }
 0x7d9   :  { %1092 = vrot.lane.b32.xlu1 %v1088_v43, %s2246_s11 }
 0x82c   :  { %v1215_v30 = vpop.xlane.xlu0 %1214 }
 0x830   :  { %v543_v6 = vpop.xlane.xlu0 %542  ;;  %v1218_v40 = vpop.xlane.xlu1 %1217 }
 0x831   :  { %1967 = vrcp.f32 %v543_v6 }
 0x834   :  { %v546_v45 = vpop.xlane.xlu1 %545 }
 0x835   :  { %1969 = vrcp.f32 %v546_v45 }
 0x836   :  { %1971 = vrcp.f32 %v1215_v30  ;;  %v2760_v30 = vld [vmem:[#allocation17] ss:$0 sm:$0xff] }
 0x837   :  { %1973 = vrcp.f32 %v1218_v40 }
 0x83b   :  { %v1968_v46 = vpop.eup %1967 }
 0x83c   :  { %v637_v12 = vmul.f32 %v1968_v46, %v2607_v22  ;;  %v1935_v22 = vld [vmem:[%s2815_s10] sm:$0xff]  }
 0x83d   :  { %1879 = vmatpush3.bf16.msra.mxu1 %v1935_v22  ;;  %v1694_v22 = vld [vmem:[%s2820_s15] ss:$0 sm:$0xff]  ;;  %s2260_s15 = smov [#allocation20]  }
 0x83e   :  { %639 = vst.msk [vmem:[#allocation2] sm:$0xff] %vm435_vm2, %v637_v12  ;;  %1880 = vmatprep.subr.bf16.mxu1 %v2253_v0  ;;  %v2763_v12 = vld [vmem:[#allocation18] ss:$0 sm:$0xff] }
 0x83f   :  { %v1970_v49 = vpop.eup %1969 }
 0x840   :  { %v638_v51 = vmul.f32 %v1970_v49, %v2609_v26  ;;  %v1936_v26 = vld [vmem:[%s2815_s10 + $0x8] sm:$0xff]   ;;  %v1972_v57 = vpop.eup %1971 }
 0x841   :  { %1881 = vmatpush3.bf16.msra.mxu1 %v1936_v26  ;;  %v1974_v2 = vpop.eup %1973 }
 0x842   :  { %640 = vst.msk [vmem:[#allocation2 + $0x8] sm:$0xff] %vm435_vm2, %v638_v51  ;;  %1894 = vmatprep.subr.bf16.mxu1 %v2253_v0 }
 0x843   :  { %v866_v50 = vpop.permute.xlu0 %865 }
 0x844   :  { %872 = vst.msk [vmem:[#allocation2] sm:$0xff] %vm871_vm4, %v866_v50 }
 0x847   :  { %v868_v54 = vpop.permute.xlu1 %867 }
 0x848   :  { %v1095_v55 = vpop.permute.xlu0 %1094  ;;  %873 = vst.msk [vmem:[#allocation2 + $0x8] sm:$0xff] %vm871_vm4, %v868_v54 }
 0x849   :  { %1100 = vst.msk [vmem:[#allocation2 + $0x8] sm:$0xff] %vm1098_vm5, %v1095_v55  ;;  %v1941_v55 = vld [vmem:[%s2821_s16 + $0x10] sm:$0xff]  }
 0x84b   :  { %v1093_v56 = vpop.permute.xlu1 %1092 }
 0x84c   :  { %1099 = vst.msk [vmem:[#allocation2] sm:$0xff] %vm1098_vm5, %v1093_v56  ;;  %v1942_v56 = vld [vmem:[%s2821_s16 + $0x18] sm:$0xff]   ;;  %s1639_s16 = sshll.u32 %s2260_s15, 4  ;;  %s1640_s16 = int_to_ptr.vmem [resolvable:$true] %s1639_s16 }
 0x84d   :  { %p2208_p11 = scmp.lt.s32.totalorder %s1640_s16, %s1640_s16 }
 0x873   :  { %v1261_v58 = vpop.f32.mrb[32].mxu1 }
 0x874   :  { %v1315_v60 = vmul.f32 %v1972_v57, %v1261_v58  ;;  %v1870_v61 = vpop.f32.mrb[33].mxu1 }
 0x875   :  { %v1264_v62 = vpop.f32.mrb[34].mxu1 }
 0x876   :  { %1319 = vrot.lane.b32.xlu1 %v1315_v60, %s2259_s29  ;;  %v1871_v1 = vpop.f32.mrb[35].mxu1 }
 0x877   :  { %v1307_v3 = vpop.f32.mrb[36].mxu0 }
 0x878   :  { %v1316_v4 = vmul.f32 %v1974_v2, %v1307_v3  ;;  %v1876_v5 = vpop.f32.mrb[37].mxu0 }
 0x879   :  { %v1310_v7 = vpop.f32.mrb[38].mxu0 }
 0x87a   :  { %v1877_v8 = vpop.f32.mrb[39].mxu0  ;;  %1321 = vrot.lane.b32.xlu0 %v1316_v4, %s2259_s29 }
 0x8e8   :  { %v1320_v9 = vpop.permute.xlu1 %1319 }
 0x8e9   :  { %1326 = vst.msk [vmem:[#allocation2] sm:$0xff] %vm1325_vm6, %v1320_v9 }
 0x8ec   :  { %v1322_v14 = vpop.permute.xlu0 %1321 }
 0x8ed   :  { %1327 = vst.msk [vmem:[#allocation2 + $0x8] sm:$0xff] %vm1325_vm6, %v1322_v14 }
 0x8f0   :  { %v1328_v15 = vld [vmem:[#allocation2] sm:$0xff] }
 0x8f4   :  { %v1329_v52 = vld [vmem:[#allocation2 + $0x8] sm:$0xff] }
 0x8f5   :  { %v1330_v17 = vpack.c.bf16 %v1329_v52, %v1328_v15 }
 0x8f7   :  { %1883 = vmatmul.mubr.msk.bf16.vlgmr.msra.gmra.mrb[36].mxu1 %vm217_vm1, %v1330_v17 }
 0x8f8   :  { %1902 = vmatprep.mubr.msk.bf16.mxu1 %vm2254_vm0, %v2253_v0  ;;  %1895 = vmatpush3.bf16.msra.mxu1 %v1939_v38 }
 0x8f9   :  { %1896 = vmatprep.subr.bf16.mxu1 %v2253_v0 }
 0x8fc   :  { %1897 = vmatpush3.bf16.msra.mxu1 %v1940_v13 }
 0x8fd   :  { %1898 = vmatprep.subr.bf16.mxu1 %v2253_v0 }
 0x900   :  { %1899 = vmatpush3.bf16.msra.mxu1 %v1941_v55 }
 0x901   :  { %1900 = vmatprep.subr.bf16.mxu1 %v2253_v0 }
 0x904   :  { %1901 = vmatpush3.bf16.msra.mxu1 %v1942_v56 }
 0x9ca   :  { %v1391_v18 = vpop.f32.mrb[36].mxu1 }
 0x9cb   :  { %v1392_v19 = vadd.f32 %v1688_v53, %v1391_v18  ;;  %v1884_v20 = vpop.f32.mrb[37].mxu1 }
 0x9cc   :  { %v1394_v47 = vpop.f32.mrb[38].mxu1 }
 0x9cd   :  { %v1395_v21 = vadd.f32 %v1688_v53, %v1394_v47  ;;  %v1885_v23 = vpop.f32.mrb[39].mxu1  ;;  %v1400_v48 = vadd.f32 %v1392_v19, %v2507_v10 }
 0x9cf   :  { %v1402_v59 = vsel %vm217_vm1, %v1400_v48, 0.0  ;;  %v1401_v24 = vadd.f32 %v1395_v21, %v2512_v11  ;;  %v1937_v11 = vld [vmem:[%s2819_s14] sm:$0xff]  }
 0x9d0   :  { %1403 = vadd.xlane.f32.xlu1 %v1402_v59  ;;  %1887 = vmatpush3.bf16.msra.mxu0 %v1937_v11 }
 0x9d1   :  { %v1405_v63 = vsel %vm217_vm1, %v1401_v24, 0.0  ;;  %1888 = vmatprep.subr.bf16.mxu0 %v2253_v0  ;;  %v1698_v0 = vld [vmem:[%s2822_s17] ss:$0 sm:$0xff]  ;;  %s2203_s17 = scalar_lea.vmem %s1640_s16, 256 }
 0x9d2   :  { %1406 = vadd.xlane.f32.xlu0 %v1405_v63  ;;  %p2204_p10 = scmp.ne.s32.totalorder %s1640_s16, %s2203_s17  ;;  %p2209_p12 = scmp.lt.s32.totalorder %s2203_s17, %s2203_s17 }
 0x9d4   :  { %1889 = vmatpush3.bf16.msra.mxu0 %v1938_v37  ;;  %p2210_p13 = por %p2209_p12, %p2208_p11 }
 0x9d6   :  { %p2211_p0 = pnand %p2210_p13, %p2204_p10 }
 0xa5d   :  { %v1404_v25 = vpop.xlane.xlu1 %1403 }
 0xa5e   :  { %v1409_v27 = vmul.f32 0.03125, %v1404_v25 }
 0xa5f   :  { %v1407_v28 = vpop.xlane.xlu0 %1406 }
 0xa60   :  { %v1411_v29 = vsub.f32 %v1400_v48, %v1409_v27  ;;  %v1410_v32 = vmul.f32 0.03125, %v1407_v28 }
 0xa62   :  { %v1412_v33 = vsub.f32 %v1401_v24, %v1410_v32  ;;  %v1413_v34 = vmul.f32 %v1411_v29, %v1411_v29 }
 0xa64   :  { %v1415_v35 = vsel %vm217_vm1, %v1413_v34, 0.0  ;;  %v1414_v36 = vmul.f32 %v1412_v33, %v1412_v33 }
 0xa65   :  { %1416 = vadd.xlane.f32.xlu0 %v1415_v35 }
 0xa66   :  { %v1418_v10 = vsel %vm217_vm1, %v1414_v36, 0.0 }
 0xa67   :  { %1419 = vadd.xlane.f32.xlu1 %v1418_v10 }
 0xaf2   :  { %v1417_v39 = vpop.xlane.xlu0 %1416 }
 0xaf3   :  { %v1421_v41 = vmul.f32 0.03125, %v1417_v39 }
 0xaf4   :  { %v1420_v42 = vpop.xlane.xlu1 %1419 }
 0xaf5   :  { %v1423_v31 = vadd.f32 1e-05, %v1421_v41  ;;  %v1422_v16 = vmul.f32 0.03125, %v1420_v42 }
 0xaf7   :  { %1975 = vrsqrt.f32 %v1423_v31  ;;  %v1424_v44 = vadd.f32 1e-05, %v1422_v16 }
 0xaf9   :  { %1977 = vrsqrt.f32 %v1424_v44 }
 0xb01   :  { %v1976_v43 = vpop.eup %1975 }
 0xb02   :  { %v1427_v6 = vmul.f32 %v1976_v43, %v1411_v29 }
 0xb03   :  { %v1978_v40 = vpop.eup %1977 }
 0xb04   :  { %v1435_v45 = vmul.f32 %v2760_v30, %v1427_v6  ;;  %v1428_v46 = vmul.f32 %v1978_v40, %v1412_v33 }
 0xb06   :  { %v1436_v49 = vmul.f32 %v2760_v30, %v1428_v46  ;;  %v1443_v51 = vadd.f32 %v2763_v12, %v1435_v45 }
 0xb08   :  { %v1444_v50 = vadd.f32 %v2763_v12, %v1436_v49 }
 0xb0a   :  { %v1445_v54 = vpack.c.bf16 %v1444_v50, %v1443_v51 }
 0xb0c   :  { %1891 = vmatmul.mubr.msk.bf16.vlgmr.msra.gmra.mrb[40].mxu0 %vm217_vm1, %v1445_v54 }
 0xbdf   :  { %v1506_v26 = vpop.f32.mrb[40].mxu0 }
 0xbe0   :  { %v1507_v57 = vadd.f32 %v1694_v22, %v1506_v26  ;;  %v1892_v58 = vpop.f32.mrb[41].mxu0 }
 0xbe1   :  { %v1509_v60 = vpop.f32.mrb[42].mxu0 }
 0xbe2   :  { %v1510_v61 = vadd.f32 %v1694_v22, %v1509_v60  ;;  %v1893_v62 = vpop.f32.mrb[43].mxu0  ;;  %v1513_v1 = vmax.f32 %v1507_v57, 0.0 }
 0xbe4   :  { %v1514_v2 = vmax.f32 %v1510_v61, 0.0 }
 0xbe6   :  { %v1515_v3 = vpack.c.bf16 %v1514_v2, %v1513_v1 }
 0xbe8   :  { %1903 = vmatmul.mubr.msk.bf16.vlgmr.msra.gmra.mrb[40].mxu1 %vm1555_vm7, %v1515_v3 }
 0xcbb   :  { %v1593_v4 = vpop.f32.mrb[40].mxu1 }
 0xcbc   :  { %v1594_v5 = vadd.f32 %v1698_v0, %v1593_v4  ;;  %v1904_v7 = vpop.f32.mrb[41].mxu1 }
 0xcbd   :  { %v1596_v8 = vpop.f32.mrb[42].mxu1 }
 0xcbe   :  { %v1597_v9 = vadd.f32 %v1698_v0, %v1596_v8  ;;  %v1905_v14 = vpop.f32.mrb[43].mxu1  ;;  %v1600_v15 = vadd.f32 %v1594_v5, %v1443_v51 }
 0xcc0   :  { %v1602_v52 = vsel %vm217_vm1, %v1600_v15, 0.0  ;;  %v1601_v17 = vadd.f32 %v1597_v9, %v1444_v50 }
 0xcc1   :  { %1603 = vadd.xlane.f32.xlu0 %v1602_v52 }
 0xcc2   :  { %v1605_v53 = vsel %vm217_vm1, %v1601_v17, 0.0 }
 0xcc3   :  { %1606 = vadd.xlane.f32.xlu1 %v1605_v53 }
 0xd4e   :  { %v1604_v18 = vpop.xlane.xlu0 %1603 }
 0xd4f   :  { %v1608_v19 = vmul.f32 0.03125, %v1604_v18 }
 0xd50   :  { %v1607_v20 = vpop.xlane.xlu1 %1606 }
 0xd51   :  { %v1610_v47 = vsub.f32 %v1600_v15, %v1608_v19  ;;  %v1609_v21 = vmul.f32 0.03125, %v1607_v20 }
 0xd53   :  { %v1611_v23 = vsub.f32 %v1601_v17, %v1609_v21  ;;  %v1612_v48 = vmul.f32 %v1610_v47, %v1610_v47 }
 0xd55   :  { %v1614_v59 = vsel %vm217_vm1, %v1612_v48, 0.0  ;;  %v1613_v24 = vmul.f32 %v1611_v23, %v1611_v23 }
 0xd56   :  { %1615 = vadd.xlane.f32.xlu0 %v1614_v59 }
 0xd57   :  { %v1617_v63 = vsel %vm217_vm1, %v1613_v24, 0.0 }
 0xd58   :  { %1618 = vadd.xlane.f32.xlu1 %v1617_v63 }
 0xde3   :  { %v1616_v25 = vpop.xlane.xlu0 %1615 }
 0xde4   :  { %v1620_v27 = vmul.f32 0.03125, %v1616_v25 }
 0xde5   :  { %v1619_v28 = vpop.xlane.xlu1 %1618 }
 0xde6   :  { %v1622_v29 = vadd.f32 1e-05, %v1620_v27  ;;  %v1621_v32 = vmul.f32 0.03125, %v1619_v28 }
 0xde8   :  { %1979 = vrsqrt.f32 %v1622_v29  ;;  %v1623_v33 = vadd.f32 1e-05, %v1621_v32 }
 0xdea   :  { %1981 = vrsqrt.f32 %v1623_v33 }
 0xdf2   :  { %v1980_v34 = vpop.eup %1979 }
 0xdf3   :  { %v1626_v35 = vmul.f32 %v1980_v34, %v1610_v47 }
 0xdf4   :  { %v1982_v36 = vpop.eup %1981 }
 0xdf5   :  { %v1628_v10 = vmul.f32 %v2760_v30, %v1626_v35  ;;  %v1627_v11 = vmul.f32 %v1982_v36, %v1611_v23 }
 0xdf7   :  { %v1629_v37 = vmul.f32 %v2760_v30, %v1627_v11  ;;  %v1630_v38 = vadd.f32 %v2763_v12, %v1628_v10 }
 0xdf9   :  { %v1631_v13 = vadd.f32 %v2763_v12, %v1629_v37  ;;  %1632 = vst.msk [vmem:[#allocation20] sm:$0xff] %vm217_vm1, %v1630_v38 }
 0xdfb   :  { %1633 = vst.msk [vmem:[#allocation20 + $0x8] sm:$0xff] %vm217_vm1, %v1631_v13 }
 0xdfc   :  { %2214 = shalt.err (!%p2211_p0)
}
 0xdfd   :  { %s2215_s25 = scalar_lea.hbm %s2823_s18, 256 }
 0xdfe   :  { %p2216_p1 = scmp.ne.s32.totalorder %s2823_s18, %s2215_s25  ;;  %p2219_p2 = scmp.lt.u32.totalorder %s2215_s25, %s2823_s18 }
 0xe00   :  { %p2221_p3 = pnand %p2219_p2, %p2216_p1 }
 0xe02   :  { %2224 = shalt.err (!%p2221_p3)
}
 0xe03   :  { %s2261_s12 = smov 128  }
 0xe04   :  { %1645 = dma.vmem_to_hbm [thread:$0]  %s1640_s16, 256, %s2823_s18, [#allocation5], %s2261_s12, %s2261_s12, %s2258_s24  }
 0xe05   :  { %2237 = dma.done.wait [#allocation5], 256  }
 0xe06   :  { %2238 = vsyncadd [#allocation5], 4294967040 }
 0xe07   :  { %1649 = vsyncpa [#allocation4], 1 }
 0xe08   :  { %1650 = vsyncpa [#allocation7], 1 }
 0xe09   :  { %1651 = vsyncpa [#allocation10], 1 }
 0xe0a   :  { %1652 = vsyncpa [#allocation13], 1 }
 0xe0b   :  { %1653 = vsyncpa [#allocation16], 1 }
 0xe0c   :  { %1654 = vsyncpa [#allocation19], 1 }
 0xe0d   :  { %1655 = vsyncpa [#allocation5], 1 }

</bundles_post_ra>
